<compile_context>
chip_gen: v7x
topology: tpu7x:2x2x1
jax: 0.10.0
libtpu: 0.0.40
codegen_flags: <defaults>
</compile_context>

<pallas_src>
from functools import partial

import jax
import jax.numpy as jnp
from jax import lax
from jax.experimental import pallas as pl
from jax.experimental.pallas import tpu as pltpu

LANE = 128                    # lane width: channel dims padded to multiples
COMPUTE_DTYPE = jnp.bfloat16  # MXU input dtype (accumulation always f32)
RAW_OUT_DTYPE = jnp.bfloat16  # raw (pre-BN) conv output dtype written to HBM
BN_EPS = 1e-5                 # PyTorch BatchNorm2d default


def _round_up(x, m):
    return (x + m - 1) // m * m


def _cdiv(a, b):
    return -(-a // b)


# ----------------------------------------------------------------------------
# Generation-aware VMEM budgets (v5e/v6e: 128 MiB per TC, v7x: 64 MiB per TC)
# ----------------------------------------------------------------------------
_VMEM_BUDGET_CACHE = None


def _vmem_budgets():
    """Returns (vmem_limit_bytes, per_step_tile_budget_bytes)."""
    global _VMEM_BUDGET_CACHE
    if _VMEM_BUDGET_CACHE is None:
        try:
            vmem = int(pltpu.get_tpu_info().vmem_capacity_bytes)
        except Exception:
            vmem = 64 * 1024 * 1024  # conservative default (v7x-sized)
        if vmem >= 96 * 1024 * 1024:      # 128 MiB parts (v5e / v6e)
            _VMEM_BUDGET_CACHE = (96 * 1024 * 1024, 36 * 1024 * 1024)
        else:                              # 64 MiB parts (v7x)
            _VMEM_BUDGET_CACHE = (48 * 1024 * 1024, 14 * 1024 * 1024)
    return _VMEM_BUDGET_CACHE


# ----------------------------------------------------------------------------
# Pallas kernel: one (h_tile x W) row-tile of a 3x3 "SAME" conv, plus per-tile
# partial BatchNorm statistics (sum, sum-of-squares) over the tile's pixels.
# ----------------------------------------------------------------------------
def _conv3x3_stats_kernel(x_lo_ref, x_h0_ref, x_h1_ref, w_ref, y_ref, st_ref,
                          *, h_valid):
    # x_lo_ref : [h_tile, W+2, Cin_p]  padded-input rows [i*h_tile, (i+1)*h_tile)
    # x_h0_ref : [1,      W+2, Cin_p]  halo row (i+1)*h_tile
    # x_h1_ref : [1,      W+2, Cin_p]  halo row (i+1)*h_tile + 1
    # w_ref    : [3, 3*Cin_p, Cout_p]  packed weights: w[dy, dx*Cin_p + c, o]
    # y_ref    : [h_tile, W, Cout_p]   raw (pre-BN) conv output, bf16
    # st_ref   : [2, Cout_p]           per-tile [sum, sum_sq], f32
    # h_valid  : static; None if every output row of every tile is real, else
    #            the true (unpadded) H so padded rows are excluded from stats.
    h_tile, w_out, cout_p = y_ref.shape
    cin_p = x_lo_ref.shape[-1]

    # Assemble the (h_tile + 2)-row input slab for this tile.
    xs = jnp.concatenate([x_lo_ref[...], x_h0_ref[...], x_h1_ref[...]], axis=0)

    # Stack the three dx-shifted views once along the lane axis (partial
    # im2col): xcat[r, x, dx*Cin_p + c] == xs[r, x + dx, c].  3 MXU matmuls
    # with K = 3*Cin_p instead of 9 tiny-K matmuls (fills the 256-deep MXU on
    # v6e/v7x; still fine on v5e).
    xcat = jnp.concatenate([xs[:, dx:dx + w_out, :] for dx in range(3)], axis=-1)
    xflat = xcat.reshape((h_tile + 2) * w_out, 3 * cin_p)

    acc = jnp.zeros((h_tile * w_out, cout_p), jnp.float32)
    for dy in range(3):
        acc = acc + jnp.dot(xflat[dy * w_out:(dy + h_tile) * w_out, :], w_ref[dy],
                            preferred_element_type=jnp.float32)

    y3 = acc.reshape(h_tile, w_out, cout_p)
    # bf16 writeback of the raw conv output: halves the dominant HBM term.
    y_ref[...] = y3.astype(y_ref.dtype)

    # Partial BatchNorm statistics (from the f32 accumulator, before the bf16
    # cast).  The exact global reduction over tiles happens outside the kernel.
    if h_valid is not None:
        # Ragged last tile: rows >= h_valid are padding; mask them out of the
        # statistics so batch stats stay exact under H padding.
        rows = (pl.program_id(1) * h_tile
                + lax.broadcasted_iota(jnp.int32, (h_tile, 1, 1), 0))
        y_st = jnp.where(rows < h_valid, y3, 0.0)
    else:
        y_st = y3
    s1 = jnp.sum(y_st, axis=(0, 1))
    s2 = jnp.sum(y_st * y_st, axis=(0, 1))
    st_ref[...] = jnp.stack([s1, s2], axis=0)


# ----------------------------------------------------------------------------
# Tile-size selection under a VMEM budget
# ----------------------------------------------------------------------------
def _vmem_estimate(h_tile, w_out, cin_p, cout_p, in_bytes):
    wp = w_out + 2
    slab_rows = h_tile + 2
    blk_in = 2 * h_tile * wp * cin_p * in_bytes        # main block, double-buffered
    blk_halo = 2 * 2 * wp * cin_p * in_bytes           # two halo rows, double-buffered
    blk_w = 9 * cin_p * cout_p * 2                     # weights: constant index_map -> one fetch
    blk_y = 2 * h_tile * w_out * cout_p * 2            # bf16 raw output, double-buffered
    blk_st = 2 * 2 * cout_p * 4
    temps = (slab_rows * wp * cin_p * in_bytes                 # xs slab concat
             + 2 * slab_rows * w_out * 3 * cin_p * in_bytes    # xcat + xflat relayout
             + h_tile * w_out * cout_p * 4                     # f32 accumulator
             + h_tile * w_out * cout_p * 4)                    # stats-mask / cast staging
    return blk_in + blk_halo + blk_w + blk_y + blk_st + temps


def _pick_h_tile(n, h, w_out, cin_p, cout_p, in_bytes, budget):
    # Largest h_tile fitting the per-step working-set budget (no divisibility
    # requirement: the caller pads H to a whole number of tiles).
    ht = 1
    for cand in range(1, h + 1):
        if _vmem_estimate(cand, w_out, cin_p, cout_p, in_bytes) <= budget:
            ht = cand
    # Keep enough parallel grid steps to feed both v7x TensorCores, but never
    # shrink tiles below an MXU-filling M (~256 output rows of the matmul).
    min_ht = min(h, max(1, _cdiv(256, w_out)))     # h_tile * W >= ~256 if possible
    target_tiles = max(1, _cdiv(4, max(n, 1)))     # aim for n * nb >= ~4
    cap = max(min_ht, _cdiv(h, target_tiles))
    return max(1, min(ht, cap))


# ----------------------------------------------------------------------------
# Tiled pallas_call wrapper: raw 3x3 conv output + per-tile BN partial stats
# ----------------------------------------------------------------------------
def conv3x3_raw_and_stats(x_pad, w_packed):
    """x_pad: [N, H+2, W+2, Cin_p] (COMPUTE_DTYPE), w_packed: [3, 3*Cin_p, Cout_p].

    Returns (y_raw [N, H, W, Cout_p] bf16, stats [N, nb, 2, Cout_p] f32)."""
    n, hp, wp, cin_p = x_pad.shape
    h, w = hp - 2, wp - 2
    cout_p = w_packed.shape[-1]

    vmem_limit, tile_budget = _vmem_budgets()
    h_tile = _pick_h_tile(n, h, w, cin_p, cout_p, x_pad.dtype.itemsize, tile_budget)
    nb = _cdiv(h, h_tile)
    h_padded = nb * h_tile
    ragged = h_padded != h
    if ragged:
        # Pad extra zero rows at the bottom; the kernel masks them out of the
        # BN statistics and the wrapper slices them off the output.
        x_pad = jnp.pad(x_pad, ((0, 0), (0, h_padded - h), (0, 0), (0, 0)))
    grid = (n, nb)

    lo_spec = pl.BlockSpec((None, h_tile, wp, cin_p), lambda b, i: (b, i, 0, 0))
    h0_spec = pl.BlockSpec((None, 1, wp, cin_p),
                           lambda b, i: (b, (i + 1) * h_tile, 0, 0))
    h1_spec = pl.BlockSpec((None, 1, wp, cin_p),
                           lambda b, i: (b, (i + 1) * h_tile + 1, 0, 0))
    w_spec = pl.BlockSpec((3, 3 * cin_p, cout_p), lambda b, i: (0, 0, 0))
    y_spec = pl.BlockSpec((None, h_tile, w, cout_p), lambda b, i: (b, i, 0, 0))
    st_spec = pl.BlockSpec((None, None, 2, cout_p), lambda b, i: (b, i, 0, 0))

    kernel = partial(_conv3x3_stats_kernel, h_valid=(h if ragged else None))

    y, st = pl.pallas_call(
        kernel,
        grid=grid,
        in_specs=[lo_spec, h0_spec, h1_spec, w_spec],
        out_specs=(y_spec, st_spec),
        out_shape=(jax.ShapeDtypeStruct((n, h_padded, w, cout_p), RAW_OUT_DTYPE),
                   jax.ShapeDtypeStruct((n, nb, 2, cout_p), jnp.float32)),
        compiler_params=pltpu.CompilerParams(
            dimension_semantics=("parallel", "parallel"),
            vmem_limit_bytes=vmem_limit),
    )(x_pad, x_pad, x_pad, w_packed)

    if ragged:
        y = y[:, :h]
    return y, st


# ----------------------------------------------------------------------------
# BatchNorm finalize (global, exact) + DoubleConv / Up glue (plain JAX, fused)
# ----------------------------------------------------------------------------
def _bn_scale_shift(stats, count, gamma_p, beta_p):
    # NOTE: E[x^2]-E[x]^2 in f32; acceptable here, clamp guards negative var.
    s = jnp.sum(stats, axis=(0, 1))                        # [2, C_p]
    mean = s[0] / count
    var = jnp.maximum(s[1] / count - mean * mean, 0.0)     # biased (train-mode norm)
    scale = gamma_p * lax.rsqrt(var + BN_EPS)
    shift = beta_p - mean * scale
    return scale, shift


def double_conv_nhwc(x, prep):
    """(conv3x3 -> BN(batch stats) -> ReLU) x 2 on an NHWC input (real channels)."""
    n, h, w, cin = x.shape
    cin_p = prep['w1_packed'].shape[1] // 3
    count = n * h * w

    # Channel pad to a lane multiple + spatial 'SAME' pad + bf16 cast: one
    # fused XLA pass.
    xp = jnp.pad(x, ((0, 0), (1, 1), (1, 1), (0, cin_p - cin))).astype(COMPUTE_DTYPE)

    y1, st1 = conv3x3_raw_and_stats(xp, prep['w1_packed'])
    sc1, sh1 = _bn_scale_shift(st1, count, prep['gamma1_p'], prep['beta1_p'])
    # BN apply (bf16 raw * f32 scale promotes to f32) + ReLU + re-pad + bf16
    # cast fuse into a single bandwidth-bound XLA op.
    a1p = jnp.pad(jnp.maximum(y1 * sc1 + sh1, 0.0),
                  ((0, 0), (1, 1), (1, 1), (0, 0))).astype(COMPUTE_DTYPE)

    y2, st2 = conv3x3_raw_and_stats(a1p, prep['w2_packed'])
    sc2, sh2 = _bn_scale_shift(st2, count, prep['gamma2_p'], prep['beta2_p'])
    return jnp.maximum(y2 * sc2 + sh2, 0.0)[..., :prep['out_ch']]


def _upsample_axis_x2(x, axis):
    """x2, align_corners=True linear resize along one axis (2-tap gather+lerp)."""
    n_in = x.shape[axis]
    if n_in == 1:
        return jnp.concatenate([x, x], axis=axis)
    n_out = 2 * n_in
    src = jnp.arange(n_out, dtype=jnp.float32) * (n_in - 1) / (n_out - 1)
    i0 = jnp.clip(jnp.floor(src).astype(jnp.int32), 0, n_in - 2)
    frac = src - i0.astype(jnp.float32)
    x0 = jnp.take(x, i0, axis=axis)
    x1 = jnp.take(x, i0 + 1, axis=axis)
    shape = [1] * x.ndim
    shape[axis] = n_out
    frac = frac.reshape(shape)
    return x0 * (1.0 - frac) + x1 * frac


def bilinear_upsample_x2_nhwc(x):
    """PyTorch nn.Upsample(scale_factor=2, mode='bilinear', align_corners=True)."""
    return _upsample_axis_x2(_upsample_axis_x2(x, 1), 2)


def up_forward_nhwc(prep, x1, x2):
    """Up.forward(x1, x2) with bilinear=True, NHWC in / NHWC out."""
    x1 = bilinear_upsample_x2_nhwc(x1)
    dy = x2.shape[1] - x1.shape[1]
    dx = x2.shape[2] - x1.shape[2]
    x1 = jnp.pad(x1, ((0, 0), (dy // 2, dy - dy // 2),
                      (dx // 2, dx - dx // 2), (0, 0)))
    # The pad + concat + lane-pad + bf16 cast all fuse into the single XLA pass
    # that materializes the (needed anyway) padded conv-1 input.
    x = jnp.concatenate([x2, x1], axis=-1)
    return double_conv_nhwc(x, prep)


def up_forward(prep, x1_nchw, x2_nchw):
    """Public API matching the PyTorch module (NCHW in / NCHW out).  In a full
    UNet you would stay NHWC and drop these boundary transposes."""
    x1 = jnp.transpose(x1_nchw, (0, 2, 3, 1))
    x2 = jnp.transpose(x2_nchw, (0, 2, 3, 1))
    out = up_forward_nhwc(prep, x1, x2)
    return jnp.transpose(out, (0, 3, 1, 2))


# ----------------------------------------------------------------------------
# Parameters (PyTorch layout) + one-time kernel-ready repacking
# ----------------------------------------------------------------------------
def make_up_params(key, in_ch, out_ch):
    mid = in_ch // 2
    k1, k2, k3, k4, k5, k6 = jax.random.split(key, 6)
    w1 = jax.random.normal(k1, (mid, in_ch, 3, 3), jnp.float32) / (3.0 * in_ch ** 0.5)
    w2 = jax.random.normal(k2, (out_ch, mid, 3, 3), jnp.float32) / (3.0 * mid ** 0.5)
    gamma1 = 1.0 + 0.1 * jax.random.normal(k3, (mid,), jnp.float32)
    beta1 = 0.1 * jax.random.normal(k4, (mid,), jnp.float32)
    gamma2 = 1.0 + 0.1 * jax.random.normal(k5, (out_ch,), jnp.float32)
    beta2 = 0.1 * jax.random.normal(k6, (out_ch,), jnp.float32)
    return dict(w1=w1, gamma1=gamma1, beta1=beta1,
                w2=w2, gamma2=gamma2, beta2=beta2)


def _pack_conv_weight(w_oihw):
    """[Cout, Cin, 3, 3] (PyTorch) -> packed [3, 3*Cin_p, Cout_p] bf16."""
    cout, cin = w_oihw.shape[0], w_oihw.shape[1]
    cin_p, cout_p = _round_up(cin, LANE), _round_up(cout, LANE)
    w_hwio = jnp.transpose(w_oihw, (2, 3, 1, 0))
    w_hwio = jnp.pad(w_hwio, ((0, 0), (0, 0), (0, cin_p - cin), (0, cout_p - cout)))
    return w_hwio.reshape(3, 3 * cin_p, cout_p).astype(COMPUTE_DTYPE)


def _pad_vec(v):
    # Padded gamma/beta lanes are exact zeros -> padded output channels stay 0.
    c = v.shape[0]
    return jnp.pad(v, (0, _round_up(c, LANE) - c)).astype(jnp.float32)


def prepare_up_params(params):
    """Hoisted (one-time) conversion to the kernel layout."""
    return dict(
        w1_packed=_pack_conv_weight(params['w1']),
        w2_packed=_pack_conv_weight(params['w2']),
        gamma1_p=_pad_vec(params['gamma1']), beta1_p=_pad_vec(params['beta1']),
        gamma2_p=_pad_vec(params['gamma2']), beta2_p=_pad_vec(params['beta2']),
        out_ch=int(params['gamma2'].shape[0]),
    )


# ----------------------------------------------------------------------------
# Pure-JAX reference (same bf16 MXU-feeding precision) for a correctness check
# ----------------------------------------------------------------------------
def _conv_bn_relu_ref(x, w_oihw, gamma, beta):
    w_hwio = jnp.transpose(w_oihw, (2, 3, 1, 0))
    y = lax.conv_general_dilated(
        x.astype(COMPUTE_DTYPE), w_hwio.astype(COMPUTE_DTYPE),
        window_strides=(1, 1), padding='SAME',
        dimension_numbers=('NHWC', 'HWIO', 'NHWC'),
        preferred_element_type=jnp.float32)
    mean = jnp.mean(y, axis=(0, 1, 2), keepdims=True)
    var = jnp.mean((y - mean) ** 2, axis=(0, 1, 2), keepdims=True)
    return jnp.maximum((y - mean) * lax.rsqrt(var + BN_EPS) * gamma + beta, 0.0)


def up_forward_ref(params, x1_nchw, x2_nchw):
    x1 = jnp.transpose(x1_nchw, (0, 2, 3, 1))
    x2 = jnp.transpose(x2_nchw, (0, 2, 3, 1))
    x1 = bilinear_upsample_x2_nhwc(x1)
    dy = x2.shape[1] - x1.shape[1]
    dx = x2.shape[2] - x1.shape[2]
    x1 = jnp.pad(x1, ((0, 0), (dy // 2, dy - dy // 2),
                      (dx // 2, dx - dx // 2), (0, 0)))
    x = jnp.concatenate([x2, x1], axis=-1)
    x = _conv_bn_relu_ref(x, params['w1'], params['gamma1'], params['beta1'])
    x = _conv_bn_relu_ref(x, params['w2'], params['gamma2'], params['beta2'])
    return jnp.transpose(x, (0, 3, 1, 2))


if __name__ == "__main__":
    key = jax.random.PRNGKey(0)
    k_x1, k_x2, k_p = jax.random.split(key, 3)

    # Up(in_ch=8, out_ch=4, bilinear=True):
    #   x1: [2, 4, 8, 8]   (deep feature: in_ch//2 channels, half resolution)
    #   x2: [2, 4, 16, 16] (skip connection)
    # concat -> [2, 8, 16, 16] -> DoubleConv(8, 4, mid=4) -> [2, 4, 16, 16]
    in_ch, out_ch = 8, 4
    x1 = jax.random.normal(k_x1, (2, in_ch // 2, 8, 8), jnp.float32)
    x2 = jax.random.normal(k_x2, (2, in_ch // 2, 16, 16), jnp.float32)

    params = make_up_params(k_p, in_ch, out_ch)
    prep = prepare_up_params(params)          # one-time weight repacking

    up_fn = jax.jit(lambda a, b: up_forward(prep, a, b))
    out = jax.block_until_ready(up_fn(x1, x2))
    assert out.shape == (2, out_ch, 16, 16), out.shape
    assert bool(jnp.all(jnp.isfinite(out)))

    ref = jax.block_until_ready(up_forward_ref(params, x1, x2))
    assert jnp.allclose(out, ref, atol=3e-2, rtol=3e-2), \
        float(jnp.max(jnp.abs(out - ref)))

    print("KERNEL_OK")
</pallas_src>

<mosaic_0001>
module attributes {stable_mosaic.version = 11 : i64} {
  func.func @_conv3x3_stats_kernel(%arg0: i32, %arg1: i32, %arg2: memref<1x16x18x128xbf16, #tpu.memory_space<vmem>>, %arg3: memref<1x1x18x128xbf16, #tpu.memory_space<vmem>>, %arg4: memref<1x1x18x128xbf16, #tpu.memory_space<vmem>>, %arg5: memref<3x384x128xbf16, #tpu.memory_space<vmem>>, %arg6: memref<1x16x16x128xbf16, #tpu.memory_space<vmem>>, %arg7: memref<1x1x2x128xf32, #tpu.memory_space<vmem>>) attributes {dimension_semantics = [#tpu.dimension_semantics<parallel>, #tpu.dimension_semantics<parallel>], iteration_bounds = array<i64: 2, 1>, scalar_prefetch = 0 : i64, scratch_operands = 0 : i64, tpu.core_type = #tpu.core_type<tc>, window_params = [{transform_indices = @transform_0, window_bounds = array<i64: 1, 16, 18, 128>}, {transform_indices = @transform_1, window_bounds = array<i64: 1, 1, 18, 128>}, {transform_indices = @transform_2, window_bounds = array<i64: 1, 1, 18, 128>}, {pipeline_mode = #tpu.pipeline_mode<synchronous>, transform_indices = @transform_3, window_bounds = array<i64: 3, 384, 128>}, {transform_indices = @transform_4, window_bounds = array<i64: 1, 16, 16, 128>}, {transform_indices = @transform_5, window_bounds = array<i64: 1, 1, 2, 128>}]} {
    %c0 = arith.constant 0 : index
    %c0_0 = arith.constant 0 : index
    %c0_1 = arith.constant 0 : index
    %c0_2 = arith.constant 0 : index
    %0 = vector.load %arg2[%c0, %c0_0, %c0_1, %c0_2] : memref<1x16x18x128xbf16, #tpu.memory_space<vmem>>, vector<1x16x18x128xbf16>
    %1 = vector.shape_cast %0 : vector<1x16x18x128xbf16> to vector<16x18x128xbf16>
    %c0_3 = arith.constant 0 : index
    %c0_4 = arith.constant 0 : index
    %c0_5 = arith.constant 0 : index
    %c0_6 = arith.constant 0 : index
    %2 = vector.load %arg3[%c0_3, %c0_4, %c0_5, %c0_6] : memref<1x1x18x128xbf16, #tpu.memory_space<vmem>>, vector<1x1x18x128xbf16>
    %3 = vector.shape_cast %2 : vector<1x1x18x128xbf16> to vector<1x18x128xbf16>
    %c0_7 = arith.constant 0 : index
    %c0_8 = arith.constant 0 : index
    %c0_9 = arith.constant 0 : index
    %c0_10 = arith.constant 0 : index
    %4 = vector.load %arg4[%c0_7, %c0_8, %c0_9, %c0_10] : memref<1x1x18x128xbf16, #tpu.memory_space<vmem>>, vector<1x1x18x128xbf16>
    %5 = vector.shape_cast %4 : vector<1x1x18x128xbf16> to vector<1x18x128xbf16>
    %6 = tpu.concatenate %1, %3, %5 in 0 : vector<16x18x128xbf16>, vector<1x18x128xbf16>, vector<1x18x128xbf16> -> vector<18x18x128xbf16>
    %7 = vector.extract_strided_slice %6 {offsets = [0, 0, 0], sizes = [18, 16, 128], strides = [1, 1, 1]} : vector<18x18x128xbf16> to vector<18x16x128xbf16>
    %8 = vector.extract_strided_slice %6 {offsets = [0, 1, 0], sizes = [18, 16, 128], strides = [1, 1, 1]} : vector<18x18x128xbf16> to vector<18x16x128xbf16>
    %9 = vector.extract_strided_slice %6 {offsets = [0, 2, 0], sizes = [18, 16, 128], strides = [1, 1, 1]} : vector<18x18x128xbf16> to vector<18x16x128xbf16>
    %10 = tpu.concatenate %7, %8, %9 in 2 : vector<18x16x128xbf16>, vector<18x16x128xbf16>, vector<18x16x128xbf16> -> vector<18x16x384xbf16>
    %11 = vector.shape_cast %10 : vector<18x16x384xbf16> to vector<288x384xbf16>
    %cst = arith.constant 0.000000e+00 : f32
    %12 = vector.broadcast %cst : f32 to vector<256x128xf32>
    %13 = vector.extract_strided_slice %11 {offsets = [0, 0], sizes = [256, 384], strides = [1, 1]} : vector<288x384xbf16> to vector<256x384xbf16>
    %c0_11 = arith.constant 0 : index
    %c0_12 = arith.constant 0 : index
    %c0_13 = arith.constant 0 : index
    %14 = vector.load %arg5[%c0_11, %c0_12, %c0_13] : memref<3x384x128xbf16, #tpu.memory_space<vmem>>, vector<1x384x128xbf16>
    %15 = vector.shape_cast %14 : vector<1x384x128xbf16> to vector<384x128xbf16>
    %cst_14 = arith.constant dense<0.000000e+00> : vector<256x128xf32>
    %16 = tpu.matmul %13, %15, %cst_14 {dimension_numbers = #tpu.dot_dimension_numbers<[1], [0], [0], [1], [0, 0, 1, 1], [], []>} : vector<256x384xbf16>, vector<384x128xbf16>, vector<256x128xf32> -> vector<256x128xf32>
    %17 = arith.addf %12, %16 : vector<256x128xf32>
    %18 = vector.extract_strided_slice %11 {offsets = [16, 0], sizes = [256, 384], strides = [1, 1]} : vector<288x384xbf16> to vector<256x384xbf16>
    %c1 = arith.constant 1 : index
    %c0_15 = arith.constant 0 : index
    %c0_16 = arith.constant 0 : index
    %19 = vector.load %arg5[%c1, %c0_15, %c0_16] : memref<3x384x128xbf16, #tpu.memory_space<vmem>>, vector<1x384x128xbf16>
    %20 = vector.shape_cast %19 : vector<1x384x128xbf16> to vector<384x128xbf16>
    %cst_17 = arith.constant dense<0.000000e+00> : vector<256x128xf32>
    %21 = tpu.matmul %18, %20, %cst_17 {dimension_numbers = #tpu.dot_dimension_numbers<[1], [0], [0], [1], [0, 0, 1, 1], [], []>} : vector<256x384xbf16>, vector<384x128xbf16>, vector<256x128xf32> -> vector<256x128xf32>
    %22 = arith.addf %17, %21 : vector<256x128xf32>
    %23 = vector.extract_strided_slice %11 {offsets = [32, 0], sizes = [256, 384], strides = [1, 1]} : vector<288x384xbf16> to vector<256x384xbf16>
    %c2 = arith.constant 2 : index
    %c0_18 = arith.constant 0 : index
    %c0_19 = arith.constant 0 : index
    %24 = vector.load %arg5[%c2, %c0_18, %c0_19] : memref<3x384x128xbf16, #tpu.memory_space<vmem>>, vector<1x384x128xbf16>
    %25 = vector.shape_cast %24 : vector<1x384x128xbf16> to vector<384x128xbf16>
    %cst_20 = arith.constant dense<0.000000e+00> : vector<256x128xf32>
    %26 = tpu.matmul %23, %25, %cst_20 {dimension_numbers = #tpu.dot_dimension_numbers<[1], [0], [0], [1], [0, 0, 1, 1], [], []>} : vector<256x384xbf16>, vector<384x128xbf16>, vector<256x128xf32> -> vector<256x128xf32>
    %27 = arith.addf %22, %26 : vector<256x128xf32>
    %28 = vector.shape_cast %27 : vector<256x128xf32> to vector<16x16x128xf32>
    %29 = arith.truncf %28 : vector<16x16x128xf32> to vector<16x16x128xbf16>
    %c0_21 = arith.constant 0 : index
    %c0_22 = arith.constant 0 : index
    %c0_23 = arith.constant 0 : index
    %c0_24 = arith.constant 0 : index
    %30 = vector.load %arg6[%c0_21, %c0_22, %c0_23, %c0_24] : memref<1x16x16x128xbf16, #tpu.memory_space<vmem>>, vector<1x16x16x128xbf16>
    %31 = vector.shape_cast %30 : vector<1x16x16x128xbf16> to vector<16x16x128xbf16>
    %32 = vector.shape_cast %29 : vector<16x16x128xbf16> to vector<1x16x16x128xbf16>
    tpu.vector_store %arg6[%c0_21, %c0_22, %c0_23, %c0_24], %32 {strides = array<i32>} : memref<1x16x16x128xbf16, #tpu.memory_space<vmem>>, vector<1x16x16x128xbf16>,
    %cst_25 = arith.constant dense<0.000000e+00> : vector<128xf32>
    %33 = vector.multi_reduction <add>, %28, %cst_25 [0, 1] : vector<16x16x128xf32> to vector<128xf32>
    %34 = arith.mulf %28, %28 : vector<16x16x128xf32>
    %cst_26 = arith.constant dense<0.000000e+00> : vector<128xf32>
    %35 = vector.multi_reduction <add>, %34, %cst_26 [0, 1] : vector<16x16x128xf32> to vector<128xf32>
    %36 = vector.shape_cast %33 : vector<128xf32> to vector<1x128xf32>
    %37 = vector.shape_cast %35 : vector<128xf32> to vector<1x128xf32>
    %38 = tpu.concatenate %36, %37 in 0 : vector<1x128xf32>, vector<1x128xf32> -> vector<2x128xf32>
    %c0_27 = arith.constant 0 : index
    %c0_28 = arith.constant 0 : index
    %c0_29 = arith.constant 0 : index
    %c0_30 = arith.constant 0 : index
    %39 = vector.load %arg7[%c0_27, %c0_28, %c0_29, %c0_30] : memref<1x1x2x128xf32, #tpu.memory_space<vmem>>, vector<1x1x2x128xf32>
    %40 = vector.shape_cast %39 : vector<1x1x2x128xf32> to vector<2x128xf32>
    %41 = vector.shape_cast %38 : vector<2x128xf32> to vector<1x1x2x128xf32>
    tpu.vector_store %arg7[%c0_27, %c0_28, %c0_29, %c0_30], %41 {strides = array<i32>} : memref<1x1x2x128xf32, #tpu.memory_space<vmem>>, vector<1x1x2x128xf32>,
    return
  }
  func.func @transform_0(%arg0: i32, %arg1: i32) -> (i32, i32, i32, i32) {
    %c0_i32 = arith.constant 0 : i32
    %c0_i32_0 = arith.constant 0 : i32
    %c0_i32_1 = arith.constant 0 : i32
    return %arg0, %arg1, %c0_i32, %c0_i32_0 : i32, i32, i32, i32
  }
  func.func @transform_1(%arg0: i32, %arg1: i32) -> (i32, i32, i32, i32) {
    %c1_i32 = arith.constant 1 : i32
    %0 = arith.addi %arg1, %c1_i32 : i32
    %c16_i32 = arith.constant 16 : i32
    %1 = arith.muli %0, %c16_i32 : i32
    %c0_i32 = arith.constant 0 : i32
    %c0_i32_0 = arith.constant 0 : i32
    %c0_i32_1 = arith.constant 0 : i32
    return %arg0, %1, %c0_i32, %c0_i32_0 : i32, i32, i32, i32
  }
  func.func @transform_2(%arg0: i32, %arg1: i32) -> (i32, i32, i32, i32) {
    %c1_i32 = arith.constant 1 : i32
    %0 = arith.addi %arg1, %c1_i32 : i32
    %c16_i32 = arith.constant 16 : i32
    %1 = arith.muli %0, %c16_i32 : i32
    %c1_i32_0 = arith.constant 1 : i32
    %2 = arith.addi %1, %c1_i32_0 : i32
    %c0_i32 = arith.constant 0 : i32
    %c0_i32_1 = arith.constant 0 : i32
    %c0_i32_2 = arith.constant 0 : i32
    return %arg0, %2, %c0_i32, %c0_i32_1 : i32, i32, i32, i32
  }
  func.func @transform_3(%arg0: i32, %arg1: i32) -> (i32, i32, i32) {
    %c0_i32 = arith.constant 0 : i32
    %c0_i32_0 = arith.constant 0 : i32
    %c0_i32_1 = arith.constant 0 : i32
    %c0_i32_2 = arith.constant 0 : i32
    return %c0_i32, %c0_i32_0, %c0_i32_1 : i32, i32, i32
  }
  func.func @transform_4(%arg0: i32, %arg1: i32) -> (i32, i32, i32, i32) {
    %c0_i32 = arith.constant 0 : i32
    %c0_i32_0 = arith.constant 0 : i32
    %c0_i32_1 = arith.constant 0 : i32
    return %arg0, %arg1, %c0_i32, %c0_i32_0 : i32, i32, i32, i32
  }
  func.func @transform_5(%arg0: i32, %arg1: i32) -> (i32, i32, i32, i32) {
    %c0_i32 = arith.constant 0 : i32
    %c0_i32_0 = arith.constant 0 : i32
    %c0_i32_1 = arith.constant 0 : i32
    return %arg0, %arg1, %c0_i32, %c0_i32_0 : i32, i32, i32, i32
  }
}

</mosaic_0001>

<bundles_post_ra>
// kernel: _lambda_.2
= control target key start
LH: loop header
LB: loop body
LE: loop exit
PB: predicated region body
PF: predicated region fallthrough
CT: control target
= control target key end

     0   :  { %s4271_s18 = smov 0   ;;  %s4273_s19 = smov 0   ;;  %s5324_s0 = inlined_call_operand.vmem [shape: bf16[2,18,18,128], index: 0, kind: input, shape index: {}, may-alias: {0,1,2}]   ;;  %s5325_s1 = inlined_call_operand.vmem [shape: bf16[2,18,18,128], index: 1, kind: input, shape index: {}, may-alias: {0,1,2}]   ;;  %s5326_s2 = inlined_call_operand.vmem [shape: bf16[2,18,18,128], index: 2, kind: input, shape index: {}, may-alias: {0,1,2}]   ;;  %s5327_s3 = inlined_call_operand.vmem [shape: bf16[3,384,128], index: 3, kind: input, shape index: {}]   ;;  %s5328_s4 = inlined_call_operand.vmem [shape: bf16[2,16,16,128], index: 4, kind: output, shape index: {0}]   ;;  %s5329_s5 = inlined_call_operand.vmem [shape: f32[2,1,2,128], index: 5, kind: output, shape index: {1}]  }
   0x1   :  { %s4275_s20 = smov 0  }
   0x2 LB: > { %s28_s21 = sadd.s32 1, %s4235_s19  ;;  %p2969_p0 = scmp.ge.s32.totalorder %s4239_s20, 1  ;;  %s4239_s20 = sphi %s4275_s20, %s16_s20   ;;  %s4235_s19 = sphi %s4273_s19, %s5333_s19   ;;  %s4231_s18 = sphi %s4271_s18, %s5332_s18  }
   0x3   : > { %p30_p1 = scmp.ge.s32.totalorder %s28_s21, 2  ;;  %p276_p2 = scmp.lt.s32.totalorder %s4239_s20, 3 }
   0x5   : > { %s5335_s21 = smov (%p30_p1, %s28_s21), 0  ;;  %p277_p3 = pnand %p2969_p0, %p276_p2 }
   0x7   : > { %280 = sbr.rel (%p277_p3) target bundleno = 568 (0x238), region = 36 }
   0xe   : > { %v4101_v0 = vld [vmem:[%s5327_s3 + $0x100] sm:$0xff]   ;;  %p355_p4 = scmp.lt.s32.totalorder %s4231_s18, 1  ;;  %v4104_v3 = vld [vmem:[%s5327_s3 + $0x108] sm:$0xff]   ;;  %v4107_v6 = vld [vmem:[%s5327_s3 + $0x110] sm:$0xff]   ;;  %vm868_vm0 = vcmask 1046528   ;;  %vm2783_vm2 = vcmask 1040384  }
   0xf   : > { %v4295_v1 = vld [vmem:[%s5327_s3 + $0x140] sm:$0xff]   ;;  %3346 = vmatprep.subr.bf16.mxu0 %v4101_v0  ;;  %v4310_v4 = vld [vmem:[%s5327_s3 + $0x148] sm:$0xff]   ;;  %v4322_v7 = vld [vmem:[%s5327_s3 + $0x150] sm:$0xff]   ;;  %vm633_vm1 = vsmask.f32 7424 }
  0x10   : > { %v4103_v2 = vld [vmem:[%s5327_s3 + $0xc0] sm:$0xff]   ;;  %3898 = vmatprep.subr.bf16.mxu1 %v4295_v1  ;;  %s5337_s18 = smov (!%p355_p4, %s4231_s18), 1  ;;  %v4106_v5 = vld [vmem:[%s5327_s3 + $0xc8] sm:$0xff]   ;;  %v4109_v8 = vld [vmem:[%s5327_s3 + $0xd0] sm:$0xff]  }
  0x11   : > { %3347 = vmatpush3.bf16.msra.mxu0 %v4103_v2  ;;  %3906 = vmatpush3.bf16.msra.mxu1 %v4295_v1  ;;  %v4110_v9 = vld [vmem:[%s5327_s3 + $0x118] sm:$0xff]   ;;  %v4113_v12 = vld [vmem:[%s5327_s3 + $0x120] sm:$0xff]   ;;  %v4116_v15 = vld [vmem:[%s5327_s3 + $0x128] sm:$0xff]   ;;  %s4364_s10 = smul.u32 216, %s5337_s18  ;;  %s2975_s26 = sshll.u32 %s5337_s18, 1 }
  0x12   : > { %3348 = vmatprep.subr.bf16.mxu0 %v4104_v3  ;;  %3899 = vmatprep.subr.bf16.mxu1 %v4310_v4  ;;  %v4335_v10 = vld [vmem:[%s5327_s3 + $0x158] sm:$0xff]   ;;  %v4348_v13 = vld [vmem:[%s5327_s3 + $0x160] sm:$0xff]   ;;  %v4361_v16 = vld [vmem:[%s5327_s3 + $0x168] sm:$0xff]  }
  0x13   : > { %v4112_v11 = vld [vmem:[%s5327_s3 + $0xd8] sm:$0xff]   ;;  %v4115_v14 = vld [vmem:[%s5327_s3 + $0xe0] sm:$0xff]   ;;  %v4118_v17 = vld [vmem:[%s5327_s3 + $0xe8] sm:$0xff]   ;;  %s4386_s25 = scalar_lea.vmem %s5324_s0, %s4364_s10  ;;  %s3215_s29 = sadd.s32 192, %s4364_s10 }
  0x14   : > { %v4119_v18 = vld [vmem:[%s5327_s3 + $0x130] sm:$0xff]   ;;  %v4122_v21 = vld [vmem:[%s5327_s3 + $0x138] sm:$0xff]   ;;  %v4131_v35 = vld [vmem:[%s5327_s3 + $0x40] sm:$0xff]   ;;  %s4575_s16 = scalar_lea.vmem %s5325_s1, %s3215_s29  ;;  %s3217_s9 = sadd.s32 204, %s4364_s10 }
  0x15   : > { %3349 = vmatpush3.bf16.msra.mxu0 %v4106_v5  ;;  %3907 = vmatpush3.bf16.msra.mxu1 %v4310_v4  ;;  %v4377_v19 = vld [vmem:[%s5327_s3 + $0x170] sm:$0xff]   ;;  %v4394_v22 = vld [vmem:[%s5327_s3 + $0x178] sm:$0xff]   ;;  %v4427_v37 = vld [vmem:[%s4386_s25 + $0x80] ss:$0 sps:$4 sm:$0x11]   ;;  %s4898_s13 = scalar_lea.vmem %s5326_s2, %s3217_s9  ;;  %s415_s29 = scalar_lea.vmem %s5329_s5, %s2975_s26 }
  0x16   : > { %3350 = vmatprep.subr.bf16.mxu0 %v4107_v6  ;;  %3900 = vmatprep.subr.bf16.mxu1 %v4322_v7  ;;  %v4121_v20 = vld [vmem:[%s5327_s3 + $0xf0] sm:$0xff]   ;;  %v4124_v25 = vld [vmem:[%s5327_s3 + $0xf8] sm:$0xff]   ;;  %v4132_v39 = vld [vmem:[%s5327_s3] sm:$0xff]   ;;  %v900_v42 = vrot.slane %v4427_v37, 1 }
  0x17   : > { %v4399_v23 = vld [vmem:[%s4386_s25 + $0xc] sm:$0xff]   ;;  %v4402_v24 = vld [vmem:[%s4386_s25 + $0x14] ss:$0 sps:$4 sm:$0x11]   ;;  %v4418_v31 = vld [vmem:[%s4386_s25 + $0x78] sm:$0xff]  }
  0x18   : > { %v647_v26 = vshrl.u32 %v4399_v23, 16  ;;  %v649_v27 = vshll.u32 %v4399_v23, 16  ;;  %v654_v28 = vshll.u32 %v4402_v24, 16  ;;  %v4411_v29 = vld [vmem:[%s4386_s25 + $0x6c] sm:$0xff]   ;;  %v899_v38 = vrot.slane %v4418_v31, 1  ;;  %v4456_v47 = vld [vmem:[%s4386_s25 + $0x18] sm:$0xff]  }
  0x19   : > { %3351 = vmatpush3.bf16.msra.mxu0 %v4109_v8  ;;  %3908 = vmatpush3.bf16.msra.mxu1 %v4322_v7  ;;  %v4415_v30 = vld [vmem:[%s4386_s25 + $0x74] ss:$0 sps:$4 sm:$0x11]   ;;  %v896_v34 = vrot.slane %v4411_v29, 1  ;;  %v4133_v43 = vld [vmem:[%s5327_s3 + $0x48] sm:$0xff]   ;;  %v659_v49 = vshrl.u32 %v4456_v47, 16 }
  0x1a   : > { %3352 = vmatprep.subr.bf16.mxu0 %v4110_v9  ;;  %3901 = vmatprep.subr.bf16.mxu1 %v4335_v10  ;;  %v651_v32 = vrot.slane %v649_v27, 1  ;;  %v656_v33 = vrot.slane %v654_v28, 1  ;;  %v897_v36 = vrot.slane %v4415_v30, 1  ;;  %v4448_v45 = vsel %vm868_vm0, %v899_v38, %v900_v42  ;;  %v4134_v46 = vld [vmem:[%s5327_s3 + $0x8] sm:$0xff]   ;;  %v4473_v54 = vld [vmem:[%s4386_s25 + $0x90] sm:$0xff]   ;;  %v4143_v2 = vld [vmem:[%s5327_s3 + $0x58] sm:$0xff]  }
  0x1b   : > { %v4459_v48 = vld [vmem:[%s4386_s25 + $0x20] ss:$0 sps:$4 sm:$0x11]   ;;  %v661_v50 = vshll.u32 %v4456_v47, 16  ;;  %v4466_v52 = vld [vmem:[%s4386_s25 + $0x84] sm:$0xff]   ;;  %v4141_v58 = vld [vmem:[%s5327_s3 + $0x50] sm:$0xff]  }
  0x1c   : > { %v652_v40 = vor.u32 %v651_v32, %v647_v26  ;;  %v4435_v41 = vsel %vm868_vm0, %v896_v34, %v897_v36  ;;  %v666_v51 = vshll.u32 %v4459_v48, 16  ;;  %v4470_v53 = vld [vmem:[%s4386_s25 + $0x8c] ss:$0 sps:$4 sm:$0x11]   ;;  %v902_v57 = vrot.slane %v4466_v52, 1  ;;  %v4142_v62 = vld [vmem:[%s5327_s3 + $0x10] sm:$0xff]  }
  0x1d   : > { %3353 = vmatpush3.bf16.msra.mxu0 %v4112_v11  ;;  %3909 = vmatpush3.bf16.msra.mxu1 %v4335_v10  ;;  %v663_v55 = vrot.slane %v661_v50, 1  ;;  %v903_v59 = vrot.slane %v4470_v53, 1  ;;  %v4481_v60 = vld [vmem:[%s4386_s25 + $0x98] ss:$0 sps:$4 sm:$0x11]   ;;  %v905_v61 = vrot.slane %v4473_v54, 1 }
  0x1e   : > { %3354 = vmatprep.subr.bf16.mxu0 %v4113_v12  ;;  %3902 = vmatprep.subr.bf16.mxu1 %v4348_v13  ;;  %v4442_v44 = vsel %vm633_vm1, %v652_v40, %v656_v33  ;;  %v668_v56 = vrot.slane %v666_v51, 1  ;;  %v4144_v5 = vld [vmem:[%s5327_s3 + $0x18] sm:$0xff]   ;;  %v4511_v6 = vld [vmem:[%s4386_s25 + $0x24] sm:$0xff]   ;;  %v4514_v8 = vld [vmem:[%s4386_s25 + $0x2c] ss:$0 sps:$4 sm:$0x11]  }
  0x1f   : > { %3786 = vmatprep.mubr.bf16.mxu1 %v4435_v41  ;;  %1214 = vmatprep.mubr.bf16.mxu0 %v4442_v44  ;;  %v664_v63 = vor.u32 %v663_v55, %v659_v49  ;;  %v4490_v0 = vsel %vm868_vm0, %v902_v57, %v903_v59  ;;  %v671_v9 = vshrl.u32 %v4511_v6, 16  ;;  %v673_v11 = vshll.u32 %v4511_v6, 16  ;;  %v4536_v26 = vld [vmem:[%s4386_s25 + $0xb0] ss:$0 sps:$4 sm:$0x11]   ;;  %v4152_v28 = vld [vmem:[%s5327_s3 + $0x20] sm:$0xff]  }
  0x20   : > { %v678_v12 = vshll.u32 %v4514_v8, 16  ;;  %v912_v34 = vrot.slane %v4536_v26, 1  ;;  %v4154_v38 = vld [vmem:[%s5327_s3 + $0x28] sm:$0xff]   ;;  %v4568_v40 = vld [vmem:[%s4386_s25 + $0x38] ss:$0 sps:$4 sm:$0x11]  }
  0x21   : > { %3355 = vmatpush3.bf16.msra.mxu0 %v4115_v14  ;;  %3910 = vmatpush3.bf16.msra.mxu1 %v4348_v13  ;;  %v4497_v3 = vsel %vm633_vm1, %v664_v63, %v668_v56  ;;  %v4521_v14 = vld [vmem:[%s4386_s25 + $0x9c] sm:$0xff]   ;;  %v4582_v49 = vld [vmem:[%s4386_s25 + $0xb4] sm:$0xff]   ;;  %v4597_v59 = vld [vmem:[%s4575_s16 + $0x8] ss:$0 sps:$4 sm:$0x11]  }
  0x22   : > { %3356 = vmatprep.subr.bf16.mxu0 %v4116_v15  ;;  %3903 = vmatprep.subr.bf16.mxu1 %v4361_v16  ;;  %v4525_v15 = vld [vmem:[%s4386_s25 + $0xa4] ss:$0 sps:$4 sm:$0x11]   ;;  %v4586_v50 = vld [vmem:[%s4386_s25 + $0xbc] ss:$0 sps:$4 sm:$0x11]  }
  0x23   : > { %v4589_v51 = vld [vmem:[%s4575_s16] sm:$0xff]   ;;  %v914_v57 = vrot.slane %v4582_v49, 1 }
  0x25   : > { %3357 = vmatpush3.bf16.msra.mxu0 %v4118_v17  ;;  %3911 = vmatpush3.bf16.msra.mxu1 %v4361_v16  ;;  %v4528_v17 = vld [vmem:[%s4386_s25 + $0xa8] sm:$0xff]  }
  0x26   : > { %3358 = vmatprep.subr.bf16.mxu0 %v4119_v18  ;;  %3904 = vmatprep.subr.bf16.mxu1 %v4377_v19  ;;  %v675_v18 = vrot.slane %v673_v11, 1  ;;  %v911_v27 = vrot.slane %v4528_v17, 1  ;;  %v4164_v11 = vld [vmem:[%s5327_s3 + $0x38] sm:$0xff]  }
  0x28   : > { %v676_v32 = vor.u32 %v675_v18, %v671_v9  ;;  %v4629_v18 = vld [vmem:[%s4386_s25 + $0x44] ss:$0 sps:$4 sm:$0x11]  }
  0x29   : > { %3359 = vmatpush3.bf16.msra.mxu0 %v4121_v20  ;;  %3912 = vmatpush3.bf16.msra.mxu1 %v4377_v19  ;;  %v680_v20 = vrot.slane %v678_v12, 1  ;;  %v4626_v12 = vld [vmem:[%s4386_s25 + $0x3c] sm:$0xff]  }
  0x2a   : > { %3360 = vmatprep.subr.bf16.mxu0 %v4122_v21  ;;  %3905 = vmatprep.subr.bf16.mxu1 %v4394_v22  ;;  %v908_v21 = vrot.slane %v4521_v14, 1 }
  0x2b   : > { %v4552_v36 = vsel %vm633_vm1, %v676_v32, %v680_v20  ;;  %v695_v20 = vshrl.u32 %v4626_v12, 16 }
  0x2d   : > { %3361 = vmatpush3.bf16.msra.mxu0 %v4124_v25  ;;  %3913 = vmatpush3.bf16.msra.mxu1 %v4394_v22  ;;  %v909_v25 = vrot.slane %v4525_v15, 1 }
  0x2e   : > { %3754 = vmatprep.subr.bf16.mxu0 %v4295_v1  ;;  %3482 = vmatprep.subr.bf16.mxu1 %v4131_v35  ;;  %v4153_v35 = vld [vmem:[%s5327_s3 + $0x68] sm:$0xff]  }
  0x2f   : > { %v4545_v33 = vsel %vm868_vm0, %v908_v21, %v909_v25  ;;  %v697_v21 = vshll.u32 %v4626_v12, 16  ;;  %v4636_v25 = vld [vmem:[%s4386_s25] sm:$0xff]  }
  0x30   : > { %1215 = vmatmul.mubr.bf16.vlgmr.msra.gmra.mrb[0].mxu0 %v4399_v23  ;;  %3787 = vmatmul.mubr.bf16.vlgmr.msra.gmra.mrb[0].mxu1 %v4448_v45 }
  0x31   : > { %3755 = vmatpush3.bf16.msra.mxu0 %v4295_v1  ;;  %3483 = vmatpush3.bf16.msra.mxu1 %v4132_v39  ;;  %v906_v1 = vrot.slane %v4481_v60, 1  ;;  %v4565_v39 = vld [vmem:[%s4386_s25 + $0x30] sm:$0xff]   ;;  %v699_v32 = vrot.slane %v697_v21, 1 }
  0x32   : > { %3484 = vmatprep.subr.bf16.mxu1 %v4133_v43  ;;  %3756 = vmatprep.subr.bf16.mxu0 %v4310_v4  ;;  %v683_v42 = vshrl.u32 %v4565_v39, 16  ;;  %v685_v43 = vshll.u32 %v4565_v39, 16 }
  0x33   : > { %3790 = vmatprep.mubr.bf16.mxu1 %v4490_v0  ;;  %1222 = vmatprep.mubr.bf16.mxu0 %v4497_v3 }
  0x34   : > { %v687_v55 = vrot.slane %v685_v43, 1  ;;  %v700_v43 = vor.u32 %v699_v32, %v695_v20  ;;  %v4174_v20 = vld [vmem:[%s5327_s3 + $0x88] sm:$0xff]  }
  0x35   : > { %3485 = vmatpush3.bf16.msra.mxu1 %v4134_v46  ;;  %3757 = vmatpush3.bf16.msra.mxu0 %v4310_v4  ;;  %v4502_v4 = vsel %vm868_vm0, %v905_v61, %v906_v1  ;;  %v690_v46 = vshll.u32 %v4568_v40, 16  ;;  %v917_v61 = vrot.slane %v4589_v51, 1 }
  0x36   : > { %3486 = vmatprep.subr.bf16.mxu1 %v4141_v58  ;;  %3758 = vmatprep.subr.bf16.mxu0 %v4322_v7  ;;  %v915_v58 = vrot.slane %v4586_v50, 1  ;;  %v688_v63 = vor.u32 %v687_v55, %v683_v42  ;;  %v4649_v42 = vld [vmem:[%s4386_s25 + $0x48] sm:$0xff]   ;;  %v4653_v55 = vld [vmem:[%s4386_s25 + $0x50] ss:$0 sps:$4 sm:$0x11]  }
  0x37   : > { %v692_v56 = vrot.slane %v690_v46, 1 }
  0x38   : > { %1223 = vmatmul.mubr.bf16.gmra.mrb[4].mxu0 %v4456_v47  ;;  %3791 = vmatmul.mubr.bf16.gmra.mrb[4].mxu1 %v4502_v4  ;;  %v4606_v1 = vsel %vm868_vm0, %v914_v57, %v915_v58  ;;  %v707_v57 = vshrl.u32 %v4649_v42, 16  ;;  %v4658_v58 = vld [vmem:[%s4386_s25 + $0x54] sm:$0xff]  }
  0x39   : > { %3487 = vmatpush3.bf16.msra.mxu1 %v4142_v62  ;;  %3759 = vmatpush3.bf16.msra.mxu0 %v4322_v7  ;;  %v4151_v7 = vld [vmem:[%s5327_s3 + $0x60] sm:$0xff]   ;;  %v4162_v62 = vld [vmem:[%s5327_s3 + $0x30] sm:$0xff]   ;;  %v4613_v9 = vsel %vm633_vm1, %v688_v63, %v692_v56  ;;  %v714_v63 = vshll.u32 %v4653_v55, 16 }
  0x3a   : > { %3488 = vmatprep.subr.bf16.mxu1 %v4143_v2  ;;  %3760 = vmatprep.subr.bf16.mxu0 %v4335_v10  ;;  %v918_v2 = vrot.slane %v4597_v59, 1 }
  0x3b   : > { %3794 = vmatprep.mubr.bf16.mxu1 %v4545_v33  ;;  %1230 = vmatprep.mubr.bf16.mxu0 %v4552_v36 }
  0x3d   : > { %3489 = vmatpush3.bf16.msra.mxu1 %v4144_v5  ;;  %3761 = vmatpush3.bf16.msra.mxu0 %v4335_v10  ;;  %v4557_v10 = vsel %vm868_vm0, %v911_v27, %v912_v34  ;;  %v4163_v5 = vld [vmem:[%s5327_s3 + $0x78] sm:$0xff]   ;;  %v4640_v27 = vld [vmem:[%s4386_s25 + $0x8] ss:$0 sps:$4 sm:$0x11]   ;;  %v635_v34 = vshrl.u32 %v4636_v25, 16 }
  0x3e   : > { %3490 = vmatprep.subr.bf16.mxu1 %v4151_v7  ;;  %3762 = vmatprep.subr.bf16.mxu0 %v4348_v13  ;;  %v702_v7 = vshll.u32 %v4629_v18, 16 }
  0x40   : > { %1231 = vmatmul.mubr.bf16.gmra.mrb[8].mxu0 %v4511_v6  ;;  %3795 = vmatmul.mubr.bf16.gmra.mrb[8].mxu1 %v4557_v10 }
  0x41   : > { %3491 = vmatpush3.bf16.msra.mxu1 %v4152_v28  ;;  %3763 = vmatpush3.bf16.msra.mxu0 %v4348_v13  ;;  %v4161_v13 = vld [vmem:[%s5327_s3 + $0x70] sm:$0xff]   ;;  %v4169_v28 = vld [vmem:[%s5327_s3 + $0x80] sm:$0xff]  }
  0x42   : > { %3492 = vmatprep.subr.bf16.mxu1 %v4153_v35  ;;  %3764 = vmatprep.subr.bf16.mxu0 %v4361_v16  ;;  %v637_v35 = vshll.u32 %v4636_v25, 16 }
  0x43   : > { %3798 = vmatprep.mubr.bf16.mxu1 %v4606_v1  ;;  %1238 = vmatprep.mubr.bf16.mxu0 %v4613_v9 }
  0x44   : > { %v639_v46 = vrot.slane %v637_v35, 1  ;;  %v4677_v35 = vld [vmem:[%s4386_s25 + $0x60] sm:$0xff]  }
  0x45   : > { %3493 = vmatpush3.bf16.msra.mxu1 %v4154_v38  ;;  %3765 = vmatpush3.bf16.msra.mxu0 %v4361_v16  ;;  %v4618_v16 = vsel %vm868_vm0, %v917_v61, %v918_v2  ;;  %v642_v38 = vshll.u32 %v4640_v27, 16  ;;  %v4665_v2 = vld [vmem:[%s4386_s25 + $0x5c] ss:$0 sps:$4 sm:$0x11]  }
  0x46   : > { %3494 = vmatprep.subr.bf16.mxu1 %v4161_v13  ;;  %3766 = vmatprep.subr.bf16.mxu0 %v4377_v19  ;;  %v709_v13 = vshll.u32 %v4649_v42, 16  ;;  %v726_v32 = vshll.u32 %v4665_v2, 16 }
  0x47   : > { %v644_v56 = vrot.slane %v642_v38, 1 }
  0x48   : > { %1239 = vmatmul.mubr.bf16.gmra.mrb[12].mxu0 %v4565_v39  ;;  %3799 = vmatmul.mubr.bf16.gmra.mrb[12].mxu1 %v4618_v16  ;;  %v728_v38 = vrot.slane %v726_v32, 1 }
  0x49   : > { %3495 = vmatpush3.bf16.msra.mxu1 %v4162_v62  ;;  %3767 = vmatpush3.bf16.msra.mxu0 %v4377_v19  ;;  %v704_v19 = vrot.slane %v702_v7, 1  ;;  %v640_v62 = vor.u32 %v639_v46, %v635_v34  ;;  %v716_v7 = vrot.slane %v714_v63, 1 }
  0x4a   : > { %3496 = vmatprep.subr.bf16.mxu1 %v4163_v5  ;;  %3768 = vmatprep.subr.bf16.mxu0 %v4394_v22  ;;  %v719_v5 = vshrl.u32 %v4658_v58, 16 }
  0x4b   : > { %v4661_v61 = vsel %vm633_vm1, %v700_v43, %v704_v19  ;;  %v645_v21 = vsel %vm633_vm1, %v640_v62, %v644_v56  ;;  %v4681_v43 = vld [vmem:[%s4386_s25 + $0x68] ss:$0 sps:$4 sm:$0x11]  }
  0x4c   : > { %1246 = vmatprep.mubr.bf16.mxu0 %v4661_v61  ;;  %1680 = vmatprep.mubr.bf16.mxu1 %v645_v21 }
  0x4d   : > { %3497 = vmatpush3.bf16.msra.mxu1 %v4164_v11  ;;  %3769 = vmatpush3.bf16.msra.mxu0 %v4394_v22  ;;  %v711_v22 = vrot.slane %v709_v13, 1  ;;  %v721_v11 = vshll.u32 %v4658_v58, 16  ;;  %v733_v13 = vshll.u32 %v4677_v35, 16 }
  0x4e   : > { %3802 = vmatprep.subr.bf16.mxu1 %v4169_v28 }
  0x4f   : > { %v712_v19 = vor.u32 %v711_v22, %v707_v57  ;;  %v723_v34 = vrot.slane %v721_v11, 1  ;;  %v4177_v57 = vld [vmem:[%s5327_s3 + $0x90] sm:$0xff]   ;;  %v735_v63 = vrot.slane %v733_v13, 1  ;;  %v738_v22 = vshll.u32 %v4681_v43, 16 }
  0x50   : > { %1247 = vmatmul.mubr.bf16.gmra.mrb[16].mxu0 %v4626_v12  ;;  %1681 = vmatmul.mubr.bf16.vlgmr.msra.gmra.mrb[16].mxu1 %v4636_v25  ;;  %v872_v13 = vrot.slane %v4399_v23, 1 }
  0x51   : > { %3803 = vmatpush3.bf16.msra.mxu1 %v4169_v28  ;;  %v4684_v46 = vsel %vm633_vm1, %v712_v19, %v716_v7  ;;  %1688 = vmatprep.mubr.bf16.mxu1 %v4442_v44  ;;  %v724_v56 = vor.u32 %v723_v34, %v719_v5  ;;  %v731_v28 = vshrl.u32 %v4677_v35, 16  ;;  %v4178_v44 = vld [vmem:[%s5327_s3 + $0x98] sm:$0xff]   ;;  %v4182_v5 = vld [vmem:[%s5327_s3 + $0x1c0] sm:$0xff]   ;;  %v740_v21 = vrot.slane %v738_v22, 1 }
  0x52   : > { %1254 = vmatprep.mubr.bf16.mxu0 %v4684_v46  ;;  %3804 = vmatprep.subr.bf16.mxu1 %v4174_v20  ;;  %v745_v7 = vshll.u32 %v4411_v29, 16  ;;  %v743_v19 = vshrl.u32 %v4411_v29, 16 }
  0x53   : > { %v4693_v62 = vsel %vm633_vm1, %v724_v56, %v728_v38  ;;  %v736_v11 = vor.u32 %v735_v63, %v731_v28  ;;  %3618 = vmatprep.subr.bf16.mxu0 %v4182_v5  ;;  %v750_v38 = vshll.u32 %v4415_v30, 16  ;;  %v4180_v56 = vld [vmem:[%s5327_s3 + $0xa8] sm:$0xff]   ;;  %v757_v30 = vshll.u32 %v4418_v31, 16 }
  0x54   : > { %v747_v34 = vrot.slane %v745_v7, 1 }
  0x55   : > { %3805 = vmatpush3.bf16.msra.mxu1 %v4174_v20  ;;  %v4179_v20 = vld [vmem:[%s5327_s3 + $0xa0] sm:$0xff]   ;;  %v4712_v32 = vsel %vm633_vm1, %v736_v11, %v740_v21  ;;  %v752_v63 = vrot.slane %v750_v38, 1  ;;  %v759_v5 = vrot.slane %v757_v30, 1  ;;  %v762_v11 = vshll.u32 %v4427_v37, 16  ;;  %v4190_v21 = vld [vmem:[%s5327_s3 + $0xb8] sm:$0xff]  }
  0x56   : > { %3806 = vmatprep.subr.bf16.mxu1 %v4177_v57  ;;  %v748_v28 = vor.u32 %v747_v34, %v743_v19  ;;  %v769_v19 = vshll.u32 %v4466_v52, 16  ;;  %v869_v37 = vrot.slane %v4636_v25, 1  ;;  %v870_v34 = vrot.slane %v4640_v27, 1  ;;  %v4759_v25 = vld [vmem:[%s5327_s3 + $0x200] sm:$0xff]  }
  0x57   : > { %v767_v38 = vshrl.u32 %v4466_v52, 16  ;;  %v781_v30 = vshll.u32 %v4473_v54, 16 }
  0x58   : > { %1255 = vmatmul.mubr.bf16.gmra.mrb[20].mxu0 %v4649_v42  ;;  %1689 = vmatmul.mubr.bf16.gmra.mrb[20].mxu1 %v4399_v23  ;;  %v4181_v23 = vld [vmem:[%s5327_s3 + $0xb0] sm:$0xff]  }
  0x59   : > { %1262 = vmatprep.mubr.bf16.mxu0 %v4693_v62  ;;  %1696 = vmatprep.mubr.bf16.mxu1 %v4497_v3 }
  0x5a   : > { %3807 = vmatpush3.bf16.msra.mxu1 %v4177_v57  ;;  %v873_v57 = vrot.slane %v4402_v24, 1  ;;  %v755_v24 = vshrl.u32 %v4418_v31, 16 }
  0x5b   : > { %3808 = vmatprep.subr.bf16.mxu1 %v4178_v44 }
  0x5c   : > { %v4726_v22 = vsel %vm868_vm0, %v872_v13, %v873_v57  ;;  %v760_v7 = vor.u32 %v759_v5, %v755_v24  ;;  %v771_v13 = vrot.slane %v769_v19, 1  ;;  %v774_v57 = vshll.u32 %v4470_v53, 16 }
  0x5d   : > { %v783_v24 = vrot.slane %v781_v30, 1  ;;  %v786_v5 = vshll.u32 %v4481_v60, 16  ;;  %v791_v19 = vshrl.u32 %v4521_v14, 16  ;;  %v798_v60 = vshll.u32 %v4525_v15, 16 }
  0x5e   : > { %3809 = vmatpush3.bf16.msra.mxu1 %v4178_v44  ;;  %v4734_v44 = vsel %vm633_vm1, %v748_v28, %v752_v63  ;;  %v4753_v28 = vsel %vm868_vm0, %v869_v37, %v870_v34  ;;  %v772_v27 = vor.u32 %v771_v13, %v767_v38  ;;  %v776_v63 = vrot.slane %v774_v57, 1 }
  0x5f   : > { %3810 = vmatprep.subr.bf16.mxu1 %v4179_v20  ;;  %v800_v38 = vrot.slane %v798_v60, 1  ;;  %v805_v13 = vshll.u32 %v4528_v17, 16  ;;  %v810_v15 = vshll.u32 %v4536_v26, 16  ;;  %v822_v26 = vshll.u32 %v4586_v50, 16 }
  0x60   : > { %1263 = vmatmul.mubr.bf16.gmra.mrb[24].mxu0 %v4658_v58  ;;  %1697 = vmatmul.mubr.bf16.gmra.mrb[24].mxu1 %v4456_v47  ;;  %v4767_v53 = vsel %vm633_vm1, %v772_v27, %v776_v63  ;;  %v803_v27 = vshrl.u32 %v4528_v17, 16  ;;  %v834_v50 = vshll.u32 %v4597_v59, 16  ;;  %v876_v59 = vrot.slane %v4459_v48, 1 }
  0x61   : > { %1270 = vmatprep.mubr.bf16.mxu0 %v4712_v32  ;;  %1704 = vmatprep.mubr.bf16.mxu1 %v4552_v36  ;;  %v807_v63 = vrot.slane %v805_v13, 1 }
  0x62   : > { %3811 = vmatpush3.bf16.msra.mxu1 %v4179_v20  ;;  %v764_v20 = vrot.slane %v762_v11, 1 }
  0x63   : > { %3812 = vmatprep.subr.bf16.mxu1 %v4180_v56  ;;  %v808_v30 = vor.u32 %v807_v63, %v803_v27  ;;  %v836_v27 = vrot.slane %v834_v50, 1  ;;  %v890_v50 = vrot.slane %v4658_v58, 1 }
  0x66   : > { %3813 = vmatpush3.bf16.msra.mxu1 %v4180_v56  ;;  %v4749_v56 = vsel %vm633_vm1, %v760_v7, %v764_v20  ;;  %v793_v7 = vshll.u32 %v4521_v14, 16 }
  0x67   : > { %3814 = vmatprep.subr.bf16.mxu1 %v4181_v23 }
  0x68   : > { %1271 = vmatmul.mubr.bf16.gmra.mrb[28].mxu0 %v4677_v35  ;;  %1705 = vmatmul.mubr.bf16.gmra.mrb[28].mxu1 %v4511_v6  ;;  %v795_v37 = vrot.slane %v793_v7, 1 }
  0x69   : > { %1278 = vmatprep.mubr.bf16.mxu0 %v4734_v44  ;;  %1712 = vmatprep.mubr.bf16.mxu1 %v4613_v9 }
  0x6a   : > { %3815 = vmatpush3.bf16.msra.mxu1 %v4181_v23  ;;  %v779_v23 = vshrl.u32 %v4473_v54, 16  ;;  %v796_v34 = vor.u32 %v795_v37, %v791_v19  ;;  %v824_v19 = vrot.slane %v822_v26, 1  ;;  %v829_v37 = vshll.u32 %v4589_v51, 16 }
  0x6b   : > { %3816 = vmatprep.subr.bf16.mxu1 %v4190_v21  ;;  %v885_v26 = vrot.slane %v4629_v18, 1  ;;  %v4189_v18 = vld [vmem:[%s5327_s3 + $0x198] sm:$0xff]  }
  0x6c   : > { %v784_v11 = vor.u32 %v783_v24, %v779_v23  ;;  %v4787_v57 = vsel %vm633_vm1, %v796_v34, %v800_v38  ;;  %v812_v23 = vrot.slane %v810_v15, 1  ;;  %v817_v24 = vshll.u32 %v4582_v49, 16 }
  0x6d   : > { %v827_v34 = vshrl.u32 %v4589_v51, 16  ;;  %v831_v38 = vrot.slane %v829_v37, 1  ;;  %v878_v15 = vrot.slane %v4511_v6, 1  ;;  %v887_v37 = vrot.slane %v4649_v42, 1 }
  0x6e   : > { %3817 = vmatpush3.bf16.msra.mxu1 %v4190_v21  ;;  %v788_v21 = vrot.slane %v786_v5, 1  ;;  %v4797_v5 = vsel %vm633_vm1, %v808_v30, %v812_v23  ;;  %v879_v30 = vrot.slane %v4514_v8, 1  ;;  %v4184_v23 = vld [vmem:[%s5327_s3 + $0x1c8] sm:$0xff]   ;;  %v881_v8 = vrot.slane %v4565_v39, 1 }
  0x6f   : > { %3850 = vmatprep.subr.bf16.mxu1 %v4759_v25  ;;  %v832_v13 = vor.u32 %v831_v38, %v827_v34  ;;  %v888_v34 = vrot.slane %v4653_v55, 1  ;;  %v4191_v38 = vld [vmem:[%s5327_s3 + $0x1e0] sm:$0xff]  }
  0x70   : > { %1279 = vmatmul.mubr.bf16.gmra.mrb[32].mxu0 %v4411_v29  ;;  %1713 = vmatmul.mubr.bf16.gmra.mrb[32].mxu1 %v4565_v39  ;;  %v4777_v20 = vsel %vm633_vm1, %v784_v11, %v788_v21  ;;  %v815_v11 = vshrl.u32 %v4582_v49, 16  ;;  %v819_v21 = vrot.slane %v817_v24, 1  ;;  %v4840_v48 = vsel %vm868_vm0, %v878_v15, %v879_v30  ;;  %v4192_v55 = vld [vmem:[%s5327_s3 + $0x1a0] sm:$0xff]   ;;  %v4195_v30 = vld [vmem:[%s5327_s3 + $0x1f0] sm:$0xff]  }
  0x71   : > { %1286 = vmatprep.mubr.bf16.mxu0 %v4749_v56  ;;  %1720 = vmatprep.mubr.bf16.mxu1 %v4661_v61  ;;  %v4816_v63 = vsel %vm633_vm1, %v832_v13, %v836_v27  ;;  %v882_v24 = vrot.slane %v4568_v40, 1  ;;  %v4187_v40 = vld [vmem:[%s5327_s3 + $0x190] sm:$0xff]   ;;  %v891_v13 = vrot.slane %v4665_v2, 1  ;;  %v4883_v27 = vsel %vm868_vm0, %v887_v37, %v888_v34  ;;  %v4194_v2 = vld [vmem:[%s5327_s3 + $0x1a8] sm:$0xff]  }
  0x72   : > { %v820_v7 = vor.u32 %v819_v21, %v815_v11  ;;  %v4186_v11 = vld [vmem:[%s5327_s3 + $0x1d0] sm:$0xff]   ;;  %v884_v21 = vrot.slane %v4626_v12, 1  ;;  %v894_v15 = vrot.slane %v4681_v43, 1  ;;  %v4198_v43 = vld [vmem:[%s5327_s3 + $0x1b8] sm:$0xff]  }
  0x74   : > { %v4807_v60 = vsel %vm633_vm1, %v820_v7, %v824_v19  ;;  %v4857_v7 = vsel %vm868_vm0, %v881_v8, %v882_v24  ;;  %v4866_v19 = vsel %vm868_vm0, %v884_v21, %v885_v26 }
  0x78   : > { %1287 = vmatmul.mubr.bf16.gmra.mrb[36].mxu0 %v4418_v31  ;;  %1721 = vmatmul.mubr.bf16.gmra.mrb[36].mxu1 %v4626_v12 }
  0x79   : > { %1294 = vmatprep.mubr.bf16.mxu0 %v4767_v53  ;;  %1728 = vmatprep.mubr.bf16.mxu1 %v4684_v46 }
  0x80   : > { %1295 = vmatmul.mubr.bf16.gmra.mrb[40].mxu0 %v4466_v52  ;;  %1729 = vmatmul.mubr.bf16.gmra.mrb[40].mxu1 %v4649_v42 }
  0x81   : > { %1302 = vmatprep.mubr.bf16.mxu0 %v4777_v20  ;;  %1736 = vmatprep.mubr.bf16.mxu1 %v4693_v62 }
  0x88   : > { %1303 = vmatmul.mubr.bf16.gmra.mrb[44].mxu0 %v4473_v54  ;;  %1737 = vmatmul.mubr.bf16.gmra.mrb[44].mxu1 %v4658_v58 }
  0x89   : > { %1310 = vmatprep.mubr.bf16.mxu0 %v4787_v57  ;;  %1744 = vmatprep.mubr.bf16.mxu1 %v4712_v32 }
  0x90   : > { %1311 = vmatmul.mubr.bf16.gmra.mrb[48].mxu0 %v4521_v14  ;;  %1745 = vmatmul.mubr.bf16.gmra.mrb[48].mxu1 %v4677_v35 }
  0x91   : > { %1318 = vmatprep.mubr.bf16.mxu0 %v4797_v5  ;;  %1752 = vmatprep.mubr.bf16.mxu1 %v4734_v44 }
  0x98   : > { %1319 = vmatmul.mubr.bf16.gmra.mrb[52].mxu0 %v4528_v17  ;;  %1753 = vmatmul.mubr.bf16.gmra.mrb[52].mxu1 %v4411_v29  ;;  %v875_v29 = vrot.slane %v4456_v47, 1 }
  0x99   : > { %1326 = vmatprep.mubr.bf16.mxu0 %v4807_v60  ;;  %1760 = vmatprep.mubr.bf16.mxu1 %v4749_v56 }
  0xa0   : > { %1327 = vmatmul.mubr.bf16.gmra.mrb[56].mxu0 %v4582_v49  ;;  %1761 = vmatmul.mubr.bf16.gmra.mrb[56].mxu1 %v4418_v31  ;;  %v4831_v31 = vsel %vm868_vm0, %v875_v29, %v876_v59  ;;  %v4892_v29 = vsel %vm868_vm0, %v890_v50, %v891_v13  ;;  %v893_v59 = vrot.slane %v4677_v35, 1 }
  0xa1   : > { %1334 = vmatprep.mubr.bf16.mxu0 %v4816_v63  ;;  %1768 = vmatprep.mubr.bf16.mxu1 %v4767_v53 }
  0xa8   : > { %1335 = vmatmul.mubr.bf16.gmra.mrb[60].mxu0 %v4589_v51  ;;  %1769 = vmatmul.mubr.bf16.gmra.mrb[60].mxu1 %v4466_v52  ;;  %v4183_v51 = vld [vmem:[%s5327_s3 + $0x180] sm:$0xff]   ;;  %v4185_v52 = vld [vmem:[%s5327_s3 + $0x188] sm:$0xff]  }
  0xa9   : > { %3770 = vmatprep.mubr.bf16.mxu0 %v4726_v22  ;;  %1776 = vmatprep.mubr.bf16.mxu1 %v4777_v20 }
  0xb0   : > { %3771 = vmatmul.mubr.bf16.vlgmr.msra.gmra.mrb[64].mxu0 %v4831_v31  ;;  %1777 = vmatmul.mubr.bf16.gmra.mrb[64].mxu1 %v4473_v54  ;;  %v4188_v54 = vld [vmem:[%s5327_s3 + $0x1d8] sm:$0xff]  }
  0xb1   : > { %3619 = vmatpush3.bf16.msra.mxu0 %v4183_v51  ;;  %3774 = vmatprep.mubr.bf16.mxu0 %v4840_v48  ;;  %v4913_v51 = vsel %vm868_vm0, %v893_v59, %v894_v15 }
  0xb2   : > { %3620 = vmatprep.subr.bf16.mxu0 %v4184_v23  ;;  %1784 = vmatprep.mubr.bf16.mxu1 %v4787_v57  ;;  %v4196_v23 = vld [vmem:[%s5327_s3 + $0x1b0] sm:$0xff]  }
  0xb5   : > { %3621 = vmatpush3.bf16.msra.mxu0 %v4185_v52  ;;  %v4200_v52 = vld [vmem:[%s5327_s3 + $0x208] sm:$0xff]  }
  0xb6   : > { %3622 = vmatprep.subr.bf16.mxu0 %v4186_v11 }
  0xb8   : > { %3775 = vmatmul.mubr.bf16.gmra.mrb[68].mxu0 %v4857_v7  ;;  %1785 = vmatmul.mubr.bf16.gmra.mrb[68].mxu1 %v4521_v14  ;;  %v4193_v14 = vld [vmem:[%s5327_s3 + $0x1e8] sm:$0xff]  }
  0xb9   : > { %3623 = vmatpush3.bf16.msra.mxu0 %v4187_v40  ;;  %3778 = vmatprep.mubr.bf16.mxu0 %v4866_v19 }
  0xba   : > { %3624 = vmatprep.subr.bf16.mxu0 %v4188_v54  ;;  %1792 = vmatprep.mubr.bf16.mxu1 %v4797_v5 }
  0xbd   : > { %3625 = vmatpush3.bf16.msra.mxu0 %v4189_v18 }
  0xbe   : > { %3626 = vmatprep.subr.bf16.mxu0 %v4191_v38  ;;  %v4212_v38 = vld [vmem:[%s4386_s25 + $0x90] sm:$0xff]  }
  0xc0   : > { %3779 = vmatmul.mubr.bf16.gmra.mrb[72].mxu0 %v4883_v27  ;;  %1793 = vmatmul.mubr.bf16.gmra.mrb[72].mxu1 %v4528_v17  ;;  %v4197_v17 = vld [vmem:[%s5327_s3 + $0x1f8] sm:$0xff]  }
  0xc1   : > { %3627 = vmatpush3.bf16.msra.mxu0 %v4192_v55  ;;  %3782 = vmatprep.mubr.bf16.mxu0 %v4892_v29 }
  0xc2   : > { %3628 = vmatprep.subr.bf16.mxu0 %v4193_v14  ;;  %1800 = vmatprep.mubr.bf16.mxu1 %v4807_v60 }
  0xc5   : > { %3629 = vmatpush3.bf16.msra.mxu0 %v4194_v2 }
  0xc6   : > { %3630 = vmatprep.subr.bf16.mxu0 %v4195_v30 }
  0xc8   : > { %3783 = vmatmul.mubr.bf16.gmra.mrb[76].mxu0 %v4913_v51  ;;  %1801 = vmatmul.mubr.bf16.gmra.mrb[76].mxu1 %v4582_v49  ;;  %v4205_v49 = vld [vmem:[%s5327_s3 + $0x230] sm:$0xff]  }
  0xc9   : > { %3631 = vmatpush3.bf16.msra.mxu0 %v4196_v23  ;;  %2195 = vmatprep.mubr.bf16.mxu0 %v4497_v3  ;;  %v4201_v3 = vld [vmem:[%s5327_s3 + $0x210] sm:$0xff]  }
  0xca   : > { %3632 = vmatprep.subr.bf16.mxu0 %v4197_v17  ;;  %3818 = vmatprep.mubr.bf16.mxu1 %v4753_v28 }
  0xcd   : > { %3633 = vmatpush3.bf16.msra.mxu0 %v4198_v43 }
  0xd0   : > { %2196 = vmatmul.mubr.bf16.vlgmr.msra.gmra.mrb[80].mxu0 %v4456_v47  ;;  %3819 = vmatmul.mubr.bf16.vlgmr.msra.gmra.mrb[80].mxu1 %v4726_v22  ;;  %v4202_v47 = vld [vmem:[%s5327_s3 + $0x218] sm:$0xff]  }
  0xd1   : > { %2203 = vmatprep.mubr.bf16.mxu0 %v4552_v36  ;;  %3851 = vmatpush3.bf16.msra.mxu1 %v4759_v25  ;;  %v4203_v36 = vld [vmem:[%s5327_s3 + $0x220] sm:$0xff]   ;;  %v4209_v25 = vld [vmem:[%s4386_s25 + $0x6c] sm:$0xff]  }
  0xd2   : > { %3822 = vmatprep.mubr.bf16.mxu1 %v4831_v31  ;;  %3852 = vmatprep.subr.bf16.mxu1 %v4200_v52 }
  0xd5   : > { %3853 = vmatpush3.bf16.msra.mxu1 %v4200_v52 }
  0xd6   : > { %3854 = vmatprep.subr.bf16.mxu1 %v4201_v3 }
  0xd8   : > { %2204 = vmatmul.mubr.bf16.gmra.mrb[84].mxu0 %v4511_v6  ;;  %3823 = vmatmul.mubr.bf16.gmra.mrb[84].mxu1 %v4840_v48  ;;  %v4204_v6 = vld [vmem:[%s5327_s3 + $0x228] sm:$0xff]  }
  0xd9   : > { %2211 = vmatprep.mubr.bf16.mxu0 %v4613_v9  ;;  %3826 = vmatprep.mubr.bf16.mxu1 %v4857_v7 }
  0xda   : > { %3855 = vmatpush3.bf16.msra.mxu1 %v4201_v3 }
  0xdb   : > { %3856 = vmatprep.subr.bf16.mxu1 %v4202_v47 }
  0xde   : > { %3857 = vmatpush3.bf16.msra.mxu1 %v4202_v47  ;;  %v5025_v47 = vld [vmem:[%s4898_s13] sm:$0xff]  }
  0xdf   : > { %3858 = vmatprep.subr.bf16.mxu1 %v4203_v36 }
  0xe0   : > { %2212 = vmatmul.mubr.bf16.gmra.mrb[88].mxu0 %v4565_v39  ;;  %3827 = vmatmul.mubr.bf16.gmra.mrb[88].mxu1 %v4866_v19  ;;  %v4206_v39 = vld [vmem:[%s5327_s3 + $0x238] sm:$0xff]  }
  0xe1   : > { %2219 = vmatprep.mubr.bf16.mxu0 %v4661_v61  ;;  %3830 = vmatprep.mubr.bf16.mxu1 %v4883_v27 }
  0xe2   : > { %3859 = vmatpush3.bf16.msra.mxu1 %v4203_v36 }
  0xe3   : > { %3860 = vmatprep.subr.bf16.mxu1 %v4204_v6 }
  0xe6   : > { %3861 = vmatpush3.bf16.msra.mxu1 %v4204_v6 }
  0xe7   : > { %3862 = vmatprep.subr.bf16.mxu1 %v4205_v49 }
  0xe8   : > { %2220 = vmatmul.mubr.bf16.gmra.mrb[92].mxu0 %v4626_v12  ;;  %3831 = vmatmul.mubr.bf16.gmra.mrb[92].mxu1 %v4892_v29 }
  0xe9   : > { %2227 = vmatprep.mubr.bf16.mxu0 %v4684_v46  ;;  %3834 = vmatprep.mubr.bf16.mxu1 %v4913_v51 }
  0xea   : > { %3863 = vmatpush3.bf16.msra.mxu1 %v4205_v49 }
  0xeb   : > { %3864 = vmatprep.subr.bf16.mxu1 %v4206_v39 }
  0xee   : > { %3865 = vmatpush3.bf16.msra.mxu1 %v4206_v39 }
  0xf0   : > { %2228 = vmatmul.mubr.bf16.gmra.mrb[96].mxu0 %v4649_v42  ;;  %3835 = vmatmul.mubr.bf16.gmra.mrb[0].mxu1 %v4435_v41 }
  0xf1   : > { %2235 = vmatprep.mubr.bf16.mxu0 %v4693_v62  ;;  %3838 = vmatprep.mubr.bf16.mxu1 %v4448_v45 }
  0xf8   : > { %2236 = vmatmul.mubr.bf16.gmra.mrb[100].mxu0 %v4658_v58  ;;  %3839 = vmatmul.mubr.bf16.gmra.mrb[4].mxu1 %v4490_v0 }
  0xf9   : > { %2243 = vmatprep.mubr.bf16.mxu0 %v4712_v32  ;;  %3842 = vmatprep.mubr.bf16.mxu1 %v4502_v4 }
 0x100   : > { %2244 = vmatmul.mubr.bf16.gmra.mrb[104].mxu0 %v4677_v35  ;;  %3843 = vmatmul.mubr.bf16.gmra.mrb[8].mxu1 %v4545_v33 }
 0x101   : > { %2251 = vmatprep.mubr.bf16.mxu0 %v4734_v44  ;;  %3846 = vmatprep.mubr.bf16.mxu1 %v4557_v10  ;;  %v4210_v44 = vld [vmem:[%s4386_s25 + $0x78] sm:$0xff]  }
 0x103   : > { %v3362_v9 = vpop.f32.mrb[0].mxu0 }
 0x104   : > { %v3363_v12 = vpop.f32.mrb[1].mxu0 }
 0x105   : > { %v4974_v61 = vadd.f32 %v3363_v12, %v3362_v9  ;;  %v3365_v42 = vpop.f32.mrb[2].mxu0  ;;  %v841_v9 = vshll.u32 %v5025_v47, 16 }
 0x106   : > { %v3366_v46 = vpop.f32.mrb[3].mxu0 }
 0x107   : > { %v4976_v62 = vadd.f32 %v3366_v46, %v3365_v42 }
 0x108   : > { %2252 = vmatmul.mubr.bf16.gmra.mrb[108].mxu0 %v4209_v25  ;;  %3847 = vmatmul.mubr.bf16.gmra.mrb[12].mxu1 %v4606_v1 }
 0x109   : > { %2259 = vmatprep.mubr.bf16.mxu0 %v4749_v56  ;;  %3866 = vmatprep.mubr.bf16.mxu1 %v4831_v31  ;;  %v4211_v56 = vld [vmem:[%s4386_s25 + $0x84] sm:$0xff]  }
 0x10b   : > { %v3368_v58 = vpop.f32.mrb[4].mxu0 }
 0x10c   : > { %v3369_v32 = vpop.f32.mrb[5].mxu0 }
 0x10d   : > { %v4982_v22 = vadd.f32 %v3369_v32, %v3368_v58  ;;  %v3371_v28 = vpop.f32.mrb[6].mxu0 }
 0x10e   : > { %v3372_v8 = vpop.f32.mrb[7].mxu0 }
 0x10f   : > { %v4985_v24 = vadd.f32 %v3372_v8, %v3371_v28  ;;  %v839_v8 = vshrl.u32 %v5025_v47, 16 }
 0x110   : > { %2260 = vmatmul.mubr.bf16.gmra.mrb[112].mxu0 %v4210_v44  ;;  %3867 = vmatmul.mubr.bf16.vlgmr.msra.gmra.mrb[80].mxu1 %v4840_v48 }
 0x111   : > { %2267 = vmatprep.mubr.bf16.mxu0 %v4767_v53  ;;  %3870 = vmatprep.mubr.bf16.mxu1 %v4857_v7 }
 0x113   : > { %v3374_v35 = vpop.f32.mrb[8].mxu0 }
 0x114   : > { %v3375_v11 = vpop.f32.mrb[9].mxu0 }
 0x115   : > { %v4991_v21 = vadd.f32 %v3375_v11, %v3374_v35  ;;  %v3377_v26 = vpop.f32.mrb[10].mxu0  ;;  %v843_v35 = vrot.slane %v841_v9, 1 }
 0x116   : > { %v3378_v40 = vpop.f32.mrb[11].mxu0 }
 0x117   : > { %v4995_v54 = vadd.f32 %v3378_v40, %v3377_v26  ;;  %v4215_v40 = vld [vmem:[%s4386_s25 + $0xb4] sm:$0xff]  }
 0x118   : > { %2268 = vmatmul.mubr.bf16.gmra.mrb[116].mxu0 %v4211_v56  ;;  %3871 = vmatmul.mubr.bf16.gmra.mrb[84].mxu1 %v4866_v19  ;;  %v844_v56 = vor.u32 %v843_v35, %v839_v8 }
 0x119   : > { %2275 = vmatprep.mubr.bf16.mxu0 %v4777_v20  ;;  %3874 = vmatprep.mubr.bf16.mxu1 %v4883_v27 }
 0x11b   : > { %v3380_v31 = vpop.f32.mrb[12].mxu0 }
 0x11c   : > { %v3381_v18 = vpop.f32.mrb[13].mxu0 }
 0x11d   : > { %v5001_v37 = vadd.f32 %v3381_v18, %v3380_v31  ;;  %v3383_v34 = vpop.f32.mrb[14].mxu0 }
 0x11e   : > { %v3384_v53 = vpop.f32.mrb[15].mxu0 }
 0x11f   : > { %v5004_v48 = vadd.f32 %v3384_v53, %v3383_v34 }
 0x120   : > { %2276 = vmatmul.mubr.bf16.gmra.mrb[120].mxu0 %v4212_v38  ;;  %3875 = vmatmul.mubr.bf16.gmra.mrb[88].mxu1 %v4892_v29 }
 0x121   : > { %2283 = vmatprep.mubr.bf16.mxu0 %v4787_v57  ;;  %3878 = vmatprep.mubr.bf16.mxu1 %v4913_v51  ;;  %v4213_v57 = vld [vmem:[%s4386_s25 + $0x9c] sm:$0xff]  }
 0x123   : > { %v3386_v7 = vpop.f32.mrb[16].mxu0  ;;  %v3498_v19 = vpop.f32.mrb[16].mxu1 }
 0x124   : > { %v3387_v20 = vpop.f32.mrb[17].mxu0  ;;  %v3499_v55 = vpop.f32.mrb[17].mxu1 }
 0x125   : > { %v5010_v50 = vadd.f32 %v3387_v20, %v3386_v7  ;;  %v3389_v13 = vpop.f32.mrb[18].mxu0  ;;  %v5012_v14 = vadd.f32 %v3499_v55, %v3498_v19  ;;  %v3501_v2 = vpop.f32.mrb[18].mxu1 }
 0x126   : > { %v3390_v27 = vpop.f32.mrb[19].mxu0  ;;  %v3502_v15 = vpop.f32.mrb[19].mxu1 }
 0x127   : > { %v5014_v59 = vadd.f32 %v3390_v27, %v3389_v13  ;;  %v5017_v29 = vadd.f32 %v3502_v15, %v3501_v2  ;;  %v4216_v2 = vld [vmem:[%s4575_s16] sm:$0xff]  }
 0x128   : > { %2284 = vmatmul.mubr.bf16.gmra.mrb[124].mxu0 %v4213_v57  ;;  %3879 = vmatmul.mubr.bf16.gmra.mrb[92].mxu1 %v4435_v41  ;;  %v4214_v41 = vld [vmem:[%s4386_s25 + $0xa8] sm:$0xff]   ;;  %v920_v57 = vrot.slane %v5025_v47, 1  ;;  %s3218_s25 = sshll.u32 %s5337_s18, 7 }
 0x129   : > { %2291 = vmatprep.mubr.bf16.mxu0 %v4797_v5  ;;  %3882 = vmatprep.mubr.bf16.mxu1 %v4448_v45  ;;  %v4208_v45 = vld [vmem:[%s4898_s13 + $0x8] ss:$0 sps:$4 sm:$0x11]   ;;  %s5249_s24 = scalar_lea.vmem %s5328_s4, %s3218_s25 }
 0x12b   : > { %v3392_v30 = vpop.f32.mrb[20].mxu0  ;;  %v3504_v23 = vpop.f32.mrb[20].mxu1 }
 0x12c   : > { %v3393_v51 = vpop.f32.mrb[21].mxu0  ;;  %v3505_v52 = vpop.f32.mrb[21].mxu1 }
 0x12d   : > { %v5022_v17 = vadd.f32 %v3393_v51, %v3392_v30  ;;  %v3395_v43 = vpop.f32.mrb[22].mxu0  ;;  %v5027_v36 = vadd.f32 %v3505_v52, %v3504_v23  ;;  %v3507_v6 = vpop.f32.mrb[22].mxu1  ;;  %v921_v30 = vrot.slane %v4208_v45, 1 }
 0x12e   : > { %v3396_v3 = vpop.f32.mrb[23].mxu0  ;;  %v3508_v5 = vpop.f32.mrb[23].mxu1 }
 0x12f   : > { %v5029_v49 = vadd.f32 %v3396_v3, %v3395_v43  ;;  %v5032_v39 = vadd.f32 %v3508_v5, %v3507_v6 }
 0x130   : > { %2292 = vmatmul.mubr.bf16.gmra.mrb[128].mxu0 %v4214_v41  ;;  %3883 = vmatmul.mubr.bf16.gmra.mrb[0].mxu1 %v4490_v0 }
 0x131   : > { %2299 = vmatprep.mubr.bf16.mxu0 %v4807_v60  ;;  %3886 = vmatprep.mubr.bf16.mxu1 %v4502_v4  ;;  %v846_v60 = vshll.u32 %v4208_v45, 16 }
 0x133   : > { %v3398_v12 = vpop.f32.mrb[24].mxu0  ;;  %v3510_v46 = vpop.f32.mrb[24].mxu1  ;;  %v848_v31 = vrot.slane %v846_v60, 1 }
 0x134   : > { %v3399_v42 = vpop.f32.mrb[25].mxu0  ;;  %v3511_v28 = vpop.f32.mrb[25].mxu1 }
 0x135   : > { %v5039_v58 = vadd.f32 %v3399_v42, %v3398_v12  ;;  %v3401_v32 = vpop.f32.mrb[26].mxu0  ;;  %v5042_v44 = vadd.f32 %v3511_v28, %v3510_v46  ;;  %v3513_v0 = vpop.f32.mrb[26].mxu1  ;;  %v849_v13 = vsel %vm633_vm1, %v844_v56, %v848_v31  ;;  %v922_v12 = vsel %vm868_vm0, %v920_v57, %v921_v30 }
 0x136   : > { %v3402_v25 = vpop.f32.mrb[27].mxu0  ;;  %v3514_v26 = vpop.f32.mrb[27].mxu1 }
 0x137   : > { %v5044_v11 = vadd.f32 %v3402_v25, %v3401_v32  ;;  %v5047_v4 = vadd.f32 %v3514_v26, %v3513_v0 }
 0x138   : > { %2300 = vmatmul.mubr.bf16.gmra.mrb[132].mxu0 %v4215_v40  ;;  %3887 = vmatmul.mubr.bf16.gmra.mrb[4].mxu1 %v4545_v33 }
 0x139   : > { %2307 = vmatprep.mubr.bf16.mxu0 %v4816_v63  ;;  %3890 = vmatprep.mubr.bf16.mxu1 %v4557_v10 }
 0x13b   : > { %v3404_v18 = vpop.f32.mrb[28].mxu0  ;;  %v3516_v53 = vpop.f32.mrb[28].mxu1 }
 0x13c   : > { %v3405_v34 = vpop.f32.mrb[29].mxu0  ;;  %v3517_v20 = vpop.f32.mrb[29].mxu1 }
 0x13d   : > { %v5052_v38 = vadd.f32 %v3405_v34, %v3404_v18  ;;  %v3407_v7 = vpop.f32.mrb[30].mxu0  ;;  %v5055_v55 = vadd.f32 %v3517_v20, %v3516_v53  ;;  %v3519_v63 = vpop.f32.mrb[30].mxu1 }
 0x13e   : > { %v3408_v19 = vpop.f32.mrb[31].mxu0  ;;  %v3520_v33 = vpop.f32.mrb[31].mxu1 }
 0x13f   : > { %v5057_v27 = vadd.f32 %v3408_v19, %v3407_v7  ;;  %v5060_v15 = vadd.f32 %v3520_v33, %v3519_v63 }
 0x140   : > { %2308 = vmatmul.mubr.bf16.gmra.mrb[136].mxu0 %v4216_v2  ;;  %3891 = vmatmul.mubr.bf16.gmra.mrb[8].mxu1 %v4606_v1 }
 0x141   : > { %2315 = vmatprep.mubr.bf16.mxu0 %v849_v13  ;;  %3894 = vmatprep.mubr.bf16.mxu1 %v4618_v16 }
 0x143   : > { %v3410_v10 = vpop.f32.mrb[32].mxu0  ;;  %v3522_v23 = vpop.f32.mrb[32].mxu1 }
 0x144   : > { %v3411_v51 = vpop.f32.mrb[33].mxu0  ;;  %v3523_v3 = vpop.f32.mrb[33].mxu1 }
 0x145   : > { %v3412_v43 = vadd.f32 %v3411_v51, %v3410_v10  ;;  %v3413_v52 = vpop.f32.mrb[34].mxu0  ;;  %v5065_v5 = vadd.f32 %v3523_v3, %v3522_v23  ;;  %v3525_v41 = vpop.f32.mrb[34].mxu1 }
 0x146   : > { %v3414_v6 = vpop.f32.mrb[35].mxu0  ;;  %v3526_v42 = vpop.f32.mrb[35].mxu1 }
 0x147   : > { %v3415_v9 = vadd.f32 %v3414_v6, %v3413_v52  ;;  %v5069_v1 = vadd.f32 %v3526_v42, %v3525_v41 }
 0x148   : > { %2316 = vmatmul.mubr.bf16.gmra.mrb[140].mxu0 %v5025_v47  ;;  %3895 = vmatmul.mubr.bf16.gmra.mrb[12].mxu1 %v922_v12 }
 0x14b   : > { %v3416_v16 = vpop.f32.mrb[36].mxu0  ;;  %v3528_v46 = vpop.f32.mrb[36].mxu1 }
 0x14c   : > { %v3417_v45 = vpop.f32.mrb[37].mxu0  ;;  %v3529_v25 = vpop.f32.mrb[37].mxu1 }
 0x14d   : > { %v3418_v32 = vadd.f32 %v3417_v45, %v3416_v16  ;;  %v3419_v28 = vpop.f32.mrb[38].mxu0  ;;  %v5071_v35 = vadd.f32 %v3529_v25, %v3528_v46  ;;  %v3531_v60 = vpop.f32.mrb[38].mxu1 }
 0x14e   : > { %v3420_v8 = vpop.f32.mrb[39].mxu0  ;;  %v3532_v26 = vpop.f32.mrb[39].mxu1 }
 0x14f   : > { %v3421_v0 = vadd.f32 %v3420_v8, %v3419_v28  ;;  %v5073_v40 = vadd.f32 %v3532_v26, %v3531_v60 }
 0x153   : > { %v3422_v56 = vpop.f32.mrb[40].mxu0  ;;  %v3534_v47 = vpop.f32.mrb[40].mxu1 }
 0x154   : > { %v3423_v31 = vpop.f32.mrb[41].mxu0  ;;  %v3535_v53 = vpop.f32.mrb[41].mxu1 }
 0x155   : > { %v3424_v18 = vadd.f32 %v3423_v31, %v3422_v56  ;;  %v3425_v34 = vpop.f32.mrb[42].mxu0  ;;  %v5075_v20 = vadd.f32 %v3535_v53, %v3534_v47  ;;  %v3537_v19 = vpop.f32.mrb[42].mxu1 }
 0x156   : > { %v3426_v7 = vpop.f32.mrb[43].mxu0  ;;  %v3538_v63 = vpop.f32.mrb[43].mxu1 }
 0x157   : > { %v3427_v13 = vadd.f32 %v3426_v7, %v3425_v34  ;;  %v5077_v33 = vadd.f32 %v3538_v63, %v3537_v19 }
 0x15b   : > { %v3428_v2 = vpop.f32.mrb[44].mxu0  ;;  %v3540_v57 = vpop.f32.mrb[44].mxu1 }
 0x15c   : > { %v3429_v10 = vpop.f32.mrb[45].mxu0  ;;  %v3541_v23 = vpop.f32.mrb[45].mxu1 }
 0x15d   : > { %v3430_v30 = vadd.f32 %v3429_v10, %v3428_v2  ;;  %v3431_v51 = vpop.f32.mrb[46].mxu0  ;;  %v5079_v3 = vadd.f32 %v3541_v23, %v3540_v57  ;;  %v3543_v6 = vpop.f32.mrb[46].mxu1 }
 0x15e   : > { %v3432_v52 = vpop.f32.mrb[47].mxu0  ;;  %v3544_v12 = vpop.f32.mrb[47].mxu1 }
 0x15f   : > { %v3433_v41 = vadd.f32 %v3432_v52, %v3431_v51  ;;  %v5081_v42 = vadd.f32 %v3544_v12, %v3543_v6 }
 0x163   : > { %v3434_v16 = vpop.f32.mrb[48].mxu0  ;;  %v3546_v46 = vpop.f32.mrb[48].mxu1 }
 0x164   : > { %v3435_v45 = vpop.f32.mrb[49].mxu0  ;;  %v3547_v8 = vpop.f32.mrb[49].mxu1 }
 0x165   : > { %v5083_v28 = vadd.f32 %v3435_v45, %v3434_v16  ;;  %v3437_v25 = vpop.f32.mrb[50].mxu0  ;;  %v3548_v26 = vadd.f32 %v3547_v8, %v3546_v46  ;;  %v3549_v56 = vpop.f32.mrb[50].mxu1 }
 0x166   : > { %v3438_v60 = vpop.f32.mrb[51].mxu0  ;;  %v3550_v47 = vpop.f32.mrb[51].mxu1 }
 0x167   : > { %v5085_v31 = vadd.f32 %v3438_v60, %v3437_v25  ;;  %v5087_v34 = vadd.f32 %v3548_v26, %v3412_v43  ;;  %v3551_v53 = vadd.f32 %v3550_v47, %v3549_v56 }
 0x169   : > { %v5089_v7 = vadd.f32 %v3551_v53, %v3415_v9 }
 0x16b   : > { %v3440_v19 = vpop.f32.mrb[52].mxu0  ;;  %v3552_v2 = vpop.f32.mrb[52].mxu1 }
 0x16c   : > { %v3441_v63 = vpop.f32.mrb[53].mxu0  ;;  %v3553_v51 = vpop.f32.mrb[53].mxu1 }
 0x16d   : > { %v5091_v10 = vadd.f32 %v3441_v63, %v3440_v19  ;;  %v3443_v57 = vpop.f32.mrb[54].mxu0  ;;  %v3554_v52 = vadd.f32 %v3553_v51, %v3552_v2  ;;  %v3555_v6 = vpop.f32.mrb[54].mxu1 }
 0x16e   : > { %v3444_v23 = vpop.f32.mrb[55].mxu0  ;;  %v3556_v16 = vpop.f32.mrb[55].mxu1 }
 0x16f   : > { %v5093_v12 = vadd.f32 %v3444_v23, %v3443_v57  ;;  %v5095_v45 = vadd.f32 %v3554_v52, %v3418_v32  ;;  %v3557_v43 = vadd.f32 %v3556_v16, %v3555_v6 }
 0x171   : > { %v5097_v46 = vadd.f32 %v3557_v43, %v3421_v0 }
 0x173   : > { %5330 = vst [vmem:[#allocation2_spill] sm:$0xff] %v5097_v46  ;;  %v3446_v9 = vpop.f32.mrb[56].mxu0  ;;  %v3558_v8 = vpop.f32.mrb[56].mxu1 }
 0x174   : > { %v3447_v25 = vpop.f32.mrb[57].mxu0  ;;  %v3559_v56 = vpop.f32.mrb[57].mxu1 }
 0x175   : > { %v5099_v60 = vadd.f32 %v3447_v25, %v3446_v9  ;;  %v3449_v26 = vpop.f32.mrb[58].mxu0  ;;  %v3560_v53 = vadd.f32 %v3559_v56, %v3558_v8  ;;  %v3561_v19 = vpop.f32.mrb[58].mxu1 }
 0x176   : > { %v3450_v47 = vpop.f32.mrb[59].mxu0  ;;  %v3562_v2 = vpop.f32.mrb[59].mxu1 }
 0x177   : > { %v5101_v63 = vadd.f32 %v3450_v47, %v3449_v26  ;;  %v5103_v57 = vadd.f32 %v3560_v53, %v3424_v18  ;;  %v3563_v32 = vadd.f32 %v3562_v2, %v3561_v19 }
 0x179   : > { %v5105_v51 = vadd.f32 %v3563_v32, %v3427_v13 }
 0x17b   : > { %v3452_v0 = vpop.f32.mrb[60].mxu0  ;;  %v3564_v52 = vpop.f32.mrb[60].mxu1 }
 0x17c   : > { %v3453_v23 = vpop.f32.mrb[61].mxu0  ;;  %v3565_v43 = vpop.f32.mrb[61].mxu1 }
 0x17d   : > { %v5107_v6 = vadd.f32 %v3453_v23, %v3452_v0  ;;  %v3455_v16 = vpop.f32.mrb[62].mxu0  ;;  %v3566_v25 = vadd.f32 %v3565_v43, %v3564_v52  ;;  %v3567_v46 = vpop.f32.mrb[62].mxu1 }
 0x17e   : > { %v3456_v9 = vpop.f32.mrb[63].mxu0  ;;  %v3568_v26 = vpop.f32.mrb[63].mxu1 }
 0x17f   : > { %v5109_v8 = vadd.f32 %v3456_v9, %v3455_v16  ;;  %v5111_v56 = vadd.f32 %v3566_v25, %v3430_v30  ;;  %v3569_v18 = vadd.f32 %v3568_v26, %v3567_v46 }
 0x181   : > { %v5113_v47 = vadd.f32 %v3569_v18, %v3433_v41 }
 0x183   : > { %v3772_v13 = vpop.f32.mrb[64].mxu0  ;;  %v3570_v2 = vpop.f32.mrb[64].mxu1 }
 0x184   : > { %v1386_v53 = vadd.f32 %v3772_v13, %v4982_v22  ;;  %v1377_v19 = vpop.f32.mrb[65].mxu0  ;;  %v3571_v52 = vpop.f32.mrb[65].mxu1 }
 0x185   : > { %v1378_v32 = vadd.f32 %v4974_v61, %v1377_v19  ;;  %v3773_v0 = vpop.f32.mrb[66].mxu0  ;;  %v3572_v41 = vadd.f32 %v3571_v52, %v3570_v2  ;;  %v3573_v46 = vpop.f32.mrb[66].mxu1 }
 0x186   : > { %v5118_v23 = vadd.f32 %v5027_v36, %v1386_v53  ;;  %v1389_v16 = vadd.f32 %v3773_v0, %v4985_v24  ;;  %v1380_v43 = vpop.f32.mrb[67].mxu0  ;;  %v3574_v25 = vpop.f32.mrb[67].mxu1 }
 0x187   : > { %v5122_v30 = vadd.f32 %v5012_v14, %v1378_v32  ;;  %v1381_v9 = vadd.f32 %v4976_v62, %v1380_v43  ;;  %v5129_v61 = vadd.f32 %v3572_v41, %v5083_v28  ;;  %v3575_v26 = vadd.f32 %v3574_v25, %v3573_v46 }
 0x188   : > { %v5126_v22 = vadd.f32 %v5032_v39, %v1389_v16 }
 0x189   : > { %v5132_v36 = vadd.f32 %v5017_v29, %v1381_v9  ;;  %v5135_v24 = vadd.f32 %v3575_v26, %v5085_v31 }
 0x18b   : > { %v3776_v14 = vpop.f32.mrb[68].mxu0  ;;  %v3576_v53 = vpop.f32.mrb[68].mxu1 }
 0x18c   : > { %v1402_v18 = vadd.f32 %v3776_v14, %v5001_v37  ;;  %v1393_v13 = vpop.f32.mrb[69].mxu0  ;;  %v3577_v28 = vpop.f32.mrb[69].mxu1 }
 0x18d   : > { %v1394_v62 = vadd.f32 %v4991_v21, %v1393_v13  ;;  %v3777_v39 = vpop.f32.mrb[70].mxu0  ;;  %v3578_v31 = vadd.f32 %v3577_v28, %v3576_v53  ;;  %v3579_v0 = vpop.f32.mrb[70].mxu1 }
 0x18e   : > { %v5140_v19 = vadd.f32 %v5055_v55, %v1402_v18  ;;  %v1405_v2 = vadd.f32 %v3777_v39, %v5004_v48  ;;  %v1396_v29 = vpop.f32.mrb[71].mxu0  ;;  %v3580_v16 = vpop.f32.mrb[71].mxu1 }
 0x18f   : > { %v5144_v32 = vadd.f32 %v5042_v44, %v1394_v62  ;;  %v1397_v52 = vadd.f32 %v4995_v54, %v1396_v29  ;;  %v5151_v21 = vadd.f32 %v3578_v31, %v5091_v10  ;;  %v3581_v43 = vadd.f32 %v3580_v16, %v3579_v0 }
 0x190   : > { %v5148_v37 = vadd.f32 %v5060_v15, %v1405_v2 }
 0x191   : > { %v5154_v55 = vadd.f32 %v5047_v4, %v1397_v52  ;;  %v5157_v48 = vadd.f32 %v3581_v43, %v5093_v12 }
 0x193   : > { %v3780_v44 = vpop.f32.mrb[72].mxu0  ;;  %v3582_v9 = vpop.f32.mrb[72].mxu1 }
 0x194   : > { %v1418_v41 = vadd.f32 %v3780_v44, %v5022_v17  ;;  %v1409_v46 = vpop.f32.mrb[73].mxu0  ;;  %v3583_v10 = vpop.f32.mrb[73].mxu1 }
 0x195   : > { %v1410_v54 = vadd.f32 %v5010_v50, %v1409_v46  ;;  %v3781_v15 = vpop.f32.mrb[74].mxu0  ;;  %v3584_v12 = vadd.f32 %v3583_v10, %v3582_v9  ;;  %v3585_v18 = vpop.f32.mrb[74].mxu1 }
 0x196   : > { %v5162_v25 = vadd.f32 %v5071_v35, %v1418_v41  ;;  %v1421_v26 = vadd.f32 %v3781_v15, %v5029_v49  ;;  %v1412_v4 = vpop.f32.mrb[75].mxu0  ;;  %v3586_v53 = vpop.f32.mrb[75].mxu1 }
 0x197   : > { %v5166_v14 = vadd.f32 %v5065_v5, %v1410_v54  ;;  %v1413_v13 = vadd.f32 %v5014_v59, %v1412_v4  ;;  %v5173_v50 = vadd.f32 %v3584_v12, %v5099_v60  ;;  %v3587_v62 = vadd.f32 %v3586_v53, %v3585_v18 }
 0x198   : > { %v5170_v17 = vadd.f32 %v5073_v40, %v1421_v26 }
 0x199   : > { %v1718_v35 = vadd.f32 %v5069_v1, %v1413_v13  ;;  %v5177_v49 = vadd.f32 %v3587_v62, %v5101_v63 }
 0x19b   : > { %v3784_v39 = vpop.f32.mrb[76].mxu0  ;;  %v3588_v2 = vpop.f32.mrb[76].mxu1 }
 0x19c   : > { %v1434_v5 = vadd.f32 %v3784_v39, %v5052_v38  ;;  %v1425_v28 = vpop.f32.mrb[77].mxu0  ;;  %v3589_v31 = vpop.f32.mrb[77].mxu1 }
 0x19d   : > { %v1426_v59 = vadd.f32 %v5039_v58, %v1425_v28  ;;  %v3785_v29 = vpop.f32.mrb[78].mxu0  ;;  %v3590_v63 = vadd.f32 %v3589_v31, %v3588_v2  ;;  %v3591_v52 = vpop.f32.mrb[78].mxu1 }
 0x19e   : > { %v5182_v40 = vadd.f32 %v5079_v3, %v1434_v5  ;;  %v1437_v60 = vadd.f32 %v3785_v29, %v5057_v27  ;;  %v1428_v0 = vpop.f32.mrb[79].mxu0  ;;  %v3592_v43 = vpop.f32.mrb[79].mxu1 }
 0x19f   : > { %v5186_v1 = vadd.f32 %v5075_v20, %v1426_v59  ;;  %v1429_v16 = vadd.f32 %v5044_v11, %v1428_v0  ;;  %v5193_v58 = vadd.f32 %v3590_v63, %v5107_v6  ;;  %v3593_v44 = vadd.f32 %v3592_v43, %v3591_v52 }
 0x1a0   : > { %v5190_v38 = vadd.f32 %v5081_v42, %v1437_v60 }
 0x1a1   : > { %v1734_v3 = vadd.f32 %v5077_v33, %v1429_v16  ;;  %v5197_v27 = vadd.f32 %v3593_v44, %v5109_v8 }
 0x1a3   : > { %v3634_v41 = vpop.f32.mrb[80].mxu0 }
 0x1a4   : > { %v3635_v20 = vpop.f32.mrb[81].mxu0 }
 0x1a5   : > { %v3636_v46 = vadd.f32 %v3635_v20, %v3634_v41  ;;  %v3637_v9 = vpop.f32.mrb[82].mxu0 }
 0x1a6   : > { %v3638_v54 = vpop.f32.mrb[83].mxu0 }
 0x1a7   : > { %v3639_v15 = vadd.f32 %v3638_v54, %v3637_v9  ;;  %v5200_v11 = vadd.f32 %v3636_v46, %v5122_v30 }
 0x1a9   : > { %v5203_v42 = vadd.f32 %v3639_v15, %v5132_v36 }
 0x1ab   : > { %v3640_v6 = vpop.f32.mrb[84].mxu0 }
 0x1ac   : > { %v3641_v10 = vpop.f32.mrb[85].mxu0 }
 0x1ad   : > { %v3642_v26 = vadd.f32 %v3641_v10, %v3640_v6  ;;  %v3643_v33 = vpop.f32.mrb[86].mxu0 }
 0x1ae   : > { %v3644_v4 = vpop.f32.mrb[87].mxu0 }
 0x1af   : > { %v3645_v12 = vadd.f32 %v3644_v4, %v3643_v33  ;;  %v3916_v8 = vadd.f32 %v3642_v26, %v5118_v23 }
 0x1b1   : > { %v3924_v18 = vadd.f32 %v3645_v12, %v5126_v22 }
 0x1b3   : > { %v3646_v13 = vpop.f32.mrb[88].mxu0 }
 0x1b4   : > { %v3647_v53 = vpop.f32.mrb[89].mxu0 }
 0x1b5   : > { %v3648_v62 = vadd.f32 %v3647_v53, %v3646_v13  ;;  %v3649_v39 = vpop.f32.mrb[90].mxu0 }
 0x1b6   : > { %v3650_v5 = vpop.f32.mrb[91].mxu0 }
 0x1b7   : > { %v3651_v30 = vadd.f32 %v3650_v5, %v3649_v39  ;;  %v5208_v28 = vadd.f32 %v3648_v62, %v5144_v32 }
 0x1b9   : > { %v5211_v36 = vadd.f32 %v3651_v30, %v5154_v55 }
 0x1bb   : > { %v3652_v2 = vpop.f32.mrb[92].mxu0 }
 0x1bc   : > { %v3653_v59 = vpop.f32.mrb[93].mxu0 }
 0x1bd   : > { %v3654_v29 = vadd.f32 %v3653_v59, %v3652_v2  ;;  %v3655_v31 = vpop.f32.mrb[94].mxu0 }
 0x1be   : > { %v3656_v60 = vpop.f32.mrb[95].mxu0 }
 0x1bf   : > { %v3657_v23 = vadd.f32 %v3656_v60, %v3655_v31  ;;  %v5214_v22 = vadd.f32 %v3654_v29, %v5140_v19 }
 0x1c1   : > { %v5217_v0 = vadd.f32 %v3657_v23, %v5148_v37 }
 0x1c3   : > { %v3658_v63 = vpop.f32.mrb[96].mxu0 }
 0x1c4   : > { %v3659_v52 = vpop.f32.mrb[97].mxu0 }
 0x1c5   : > { %v3660_v16 = vadd.f32 %v3659_v52, %v3658_v63  ;;  %v3661_v32 = vpop.f32.mrb[98].mxu0 }
 0x1c6   : > { %v3662_v43 = vpop.f32.mrb[99].mxu0 }
 0x1c7   : > { %v3663_v44 = vadd.f32 %v3662_v43, %v3661_v32  ;;  %v5220_v55 = vadd.f32 %v3660_v16, %v5166_v14 }
 0x1c9   : > { %v5222_v41 = vadd.f32 %v3663_v44, %v1718_v35 }
 0x1cb   : > { %v3664_v20 = vpop.f32.mrb[100].mxu0 }
 0x1cc   : > { %v3665_v46 = vpop.f32.mrb[101].mxu0 }
 0x1cd   : > { %v3666_v9 = vadd.f32 %v3665_v46, %v3664_v20  ;;  %v3667_v54 = vpop.f32.mrb[102].mxu0 }
 0x1ce   : > { %v3668_v19 = vpop.f32.mrb[103].mxu0 }
 0x1cf   : > { %v3669_v15 = vadd.f32 %v3668_v19, %v3667_v54  ;;  %v5225_v37 = vadd.f32 %v3666_v9, %v5162_v25 }
 0x1d1   : > { %v5228_v6 = vadd.f32 %v3669_v15, %v5170_v17 }
 0x1d3   : > { %v3670_v10 = vpop.f32.mrb[104].mxu0 }
 0x1d4   : > { %v3671_v26 = vpop.f32.mrb[105].mxu0 }
 0x1d5   : > { %v3672_v33 = vadd.f32 %v3671_v26, %v3670_v10  ;;  %v3673_v4 = vpop.f32.mrb[106].mxu0 }
 0x1d6   : > { %v3674_v14 = vpop.f32.mrb[107].mxu0 }
 0x1d7   : > { %v3675_v12 = vadd.f32 %v3674_v14, %v3673_v4  ;;  %v5231_v35 = vadd.f32 %v3672_v33, %v5186_v1 }
 0x1d9   : > { %v5233_v13 = vadd.f32 %v3675_v12, %v1734_v3 }
 0x1db   : > { %v3676_v53 = vpop.f32.mrb[108].mxu0 }
 0x1dc   : > { %v3677_v62 = vpop.f32.mrb[109].mxu0 }
 0x1dd   : > { %v3678_v39 = vadd.f32 %v3677_v62, %v3676_v53  ;;  %v3679_v25 = vpop.f32.mrb[110].mxu0 }
 0x1de   : > { %v3680_v5 = vpop.f32.mrb[111].mxu0 }
 0x1df   : > { %v3681_v30 = vadd.f32 %v3680_v5, %v3679_v25  ;;  %v5236_v17 = vadd.f32 %v3678_v39, %v5182_v40 }
 0x1e1   : > { %v5239_v2 = vadd.f32 %v3681_v30, %v5190_v38 }
 0x1e3   : > { %v3682_v59 = vpop.f32.mrb[112].mxu0  ;;  %v3868_v31 = vpop.f32.mrb[80].mxu1 }
 0x1e4   : > { %v3683_v29 = vpop.f32.mrb[113].mxu0  ;;  %v3917_v3 = vadd.f32 %v3916_v8, %v3868_v31  ;;  %v2358_v23 = vpop.f32.mrb[81].mxu1 }
 0x1e5   : > { %v3684_v1 = vadd.f32 %v3683_v29, %v3682_v59  ;;  %v3685_v60 = vpop.f32.mrb[114].mxu0  ;;  %v3921_v52 = vadd.f32 %v5200_v11, %v2358_v23  ;;  %v3869_v16 = vpop.f32.mrb[82].mxu1  ;;  %v5331_v23 = vld [vmem:[#allocation2_spill] sm:$0xff] }
 0x1e6   : > { %v3686_v63 = vpop.f32.mrb[115].mxu0  ;;  %v3925_v40 = vadd.f32 %v3924_v18, %v3869_v16  ;;  %v2361_v44 = vpop.f32.mrb[83].mxu1  ;;  %v2716_v19 = vmul.f32 %v3917_v3, %v3917_v3 }
 0x1e7   : > { %v3687_v32 = vadd.f32 %v3686_v63, %v3685_v60  ;;  %v5244_v43 = vadd.f32 %v5087_v34, %v3684_v1  ;;  %v3929_v38 = vadd.f32 %v5203_v42, %v2361_v44  ;;  %v2714_v20 = vmul.f32 %v3921_v52, %v3921_v52 }
 0x1e8   : > { %v3259_v11 = vpack.c.bf16 %v3925_v40, %v3917_v3  ;;  %v2717_v14 = vmul.f32 %v3925_v40, %v3925_v40 }
 0x1e9   : > { %v5253_v8 = vadd.f32 %v5089_v7, %v3687_v32  ;;  %v3254_v46 = vpack.c.bf16 %v3929_v38, %v3921_v52  ;;  %v2677_v9 = vadd.f32 %v3929_v38, %v3921_v52  ;;  %v2715_v34 = vmul.f32 %v3929_v38, %v3929_v38 }
 0x1ea   : > { %3331 = vst [vmem:[%s5249_s24 + $0x8] sm:$0xff] %v3259_v11  }
 0x1eb   : > { %v3688_v54 = vpop.f32.mrb[116].mxu0  ;;  %3255 = vst [vmem:[%s5249_s24] sm:$0xff] %v3254_v46   ;;  %v2678_v15 = vadd.f32 %v3917_v3, %v2677_v9  ;;  %v2746_v10 = vadd.f32 %v2715_v34, %v2714_v20  ;;  %v3872_v26 = vpop.f32.mrb[84].mxu1 }
 0x1ec   : > { %v3689_v18 = vpop.f32.mrb[117].mxu0  ;;  %v3933_v42 = vadd.f32 %v5214_v22, %v3872_v26  ;;  %v2374_v7 = vpop.f32.mrb[85].mxu1 }
 0x1ed   : > { %v3690_v33 = vadd.f32 %v3689_v18, %v3688_v54  ;;  %v3691_v4 = vpop.f32.mrb[118].mxu0  ;;  %v2747_v53 = vadd.f32 %v2746_v10, %v2716_v19  ;;  %v3937_v62 = vadd.f32 %v5208_v28, %v2374_v7  ;;  %v2679_v39 = vadd.f32 %v3925_v40, %v2678_v15  ;;  %v3873_v25 = vpop.f32.mrb[86].mxu1 }
 0x1ee   : > { %v3692_v12 = vpop.f32.mrb[119].mxu0  ;;  %v3941_v30 = vadd.f32 %v5217_v0, %v3873_v25  ;;  %v2377_v59 = vpop.f32.mrb[87].mxu1  ;;  %v2720_v44 = vmul.f32 %v3933_v42, %v3933_v42 }
 0x1ef   : > { %v3693_v5 = vadd.f32 %v3692_v12, %v3691_v4  ;;  %v5261_v29 = vadd.f32 %v5095_v45, %v3690_v33  ;;  %v2680_v31 = vadd.f32 %v3937_v62, %v2679_v39  ;;  %v2718_v1 = vmul.f32 %v3937_v62, %v3937_v62 }
 0x1f0   : > { %v2748_v60 = vadd.f32 %v2747_v53, %v2717_v14  ;;  %v3945_v22 = vadd.f32 %v5211_v36, %v2377_v59  ;;  %v3269_v3 = vpack.c.bf16 %v3941_v30, %v3933_v42  ;;  %v2721_v9 = vmul.f32 %v3941_v30, %v3941_v30 }
 0x1f1   : > { %v5265_v63 = vadd.f32 %v5331_v23, %v3693_v5 }
 0x1f2   : > { %v2749_v28 = vadd.f32 %v2748_v60, %v2718_v1  ;;  %v3264_v52 = vpack.c.bf16 %v3945_v22, %v3937_v62  ;;  %v2681_v16 = vadd.f32 %v3945_v22, %v2680_v31  ;;  %v2719_v32 = vmul.f32 %v3945_v22, %v3945_v22  ;;  %3333 = vst [vmem:[%s5249_s24 + $0x18] sm:$0xff] %v3269_v3  }
 0x1f3   : > { %v3694_v40 = vpop.f32.mrb[120].mxu0  ;;  %v3876_v11 = vpop.f32.mrb[88].mxu1 }
 0x1f4   : > { %v3695_v0 = vpop.f32.mrb[121].mxu0  ;;  %3332 = vst [vmem:[%s5249_s24 + $0x10] sm:$0xff] %v3264_v52   ;;  %v2682_v45 = vadd.f32 %v3933_v42, %v2681_v16  ;;  %v2750_v38 = vadd.f32 %v2749_v28, %v2719_v32  ;;  %v3949_v36 = vadd.f32 %v5225_v37, %v3876_v11  ;;  %v2390_v34 = vpop.f32.mrb[89].mxu1 }
 0x1f5   : > { %v3696_v20 = vadd.f32 %v3695_v0, %v3694_v40  ;;  %v3697_v46 = vpop.f32.mrb[122].mxu0  ;;  %v3953_v19 = vadd.f32 %v5220_v55, %v2390_v34  ;;  %v3877_v10 = vpop.f32.mrb[90].mxu1 }
 0x1f6   : > { %v3698_v54 = vpop.f32.mrb[123].mxu0  ;;  %v2751_v18 = vadd.f32 %v2750_v38, %v2720_v44  ;;  %v2683_v15 = vadd.f32 %v3941_v30, %v2682_v45  ;;  %v3957_v33 = vadd.f32 %v5228_v6, %v3877_v10  ;;  %v2393_v4 = vpop.f32.mrb[91].mxu1  ;;  %v2724_v59 = vmul.f32 %v3949_v36, %v3949_v36 }
 0x1f7   : > { %v3699_v26 = vadd.f32 %v3698_v54, %v3697_v46  ;;  %v5273_v14 = vadd.f32 %v5103_v57, %v3696_v20  ;;  %v2722_v7 = vmul.f32 %v3953_v19, %v3953_v19  ;;  %v3961_v37 = vadd.f32 %v5222_v41, %v2393_v4 }
 0x1f8   : > { %v2684_v42 = vadd.f32 %v3953_v19, %v2683_v15  ;;  %v2752_v12 = vadd.f32 %v2751_v18, %v2721_v9  ;;  %v3279_v53 = vpack.c.bf16 %v3957_v33, %v3949_v36  ;;  %v2725_v3 = vmul.f32 %v3957_v33, %v3957_v33 }
 0x1f9   : > { %v5277_v62 = vadd.f32 %v5105_v51, %v3699_v26  ;;  %v3274_v39 = vpack.c.bf16 %v3961_v37, %v3953_v19  ;;  %v2723_v5 = vmul.f32 %v3961_v37, %v3961_v37 }
 0x1fa   : > { %v2753_v55 = vadd.f32 %v2752_v12, %v2722_v7  ;;  %v2685_v25 = vadd.f32 %v3961_v37, %v2684_v42  ;;  %3335 = vst [vmem:[%s5249_s24 + $0x28] sm:$0xff] %v3279_v53  }
 0x1fb   : > { %v3700_v30 = vpop.f32.mrb[124].mxu0  ;;  %3334 = vst [vmem:[%s5249_s24 + $0x20] sm:$0xff] %v3274_v39   ;;  %v3880_v1 = vpop.f32.mrb[92].mxu1 }
 0x1fc   : > { %v3701_v6 = vpop.f32.mrb[125].mxu0  ;;  %v2686_v57 = vadd.f32 %v3949_v36, %v2685_v25  ;;  %v2754_v31 = vadd.f32 %v2753_v55, %v2723_v5  ;;  %v3965_v41 = vadd.f32 %v5236_v17, %v3880_v1  ;;  %v2406_v23 = vpop.f32.mrb[93].mxu1 }
 0x1fd   : > { %v3702_v60 = vadd.f32 %v3701_v6, %v3700_v30  ;;  %v3703_v22 = vpop.f32.mrb[126].mxu0  ;;  %v3969_v52 = vadd.f32 %v5231_v35, %v2406_v23  ;;  %v3881_v32 = vpop.f32.mrb[94].mxu1 }
 0x1fe   : > { %v3704_v51 = vpop.f32.mrb[127].mxu0  ;;  %v2755_v28 = vadd.f32 %v2754_v31, %v2724_v59  ;;  %v2687_v16 = vadd.f32 %v3957_v33, %v2686_v57  ;;  %v3973_v0 = vadd.f32 %v5239_v2, %v3881_v32  ;;  %v2409_v44 = vpop.f32.mrb[95].mxu1  ;;  %v2728_v2 = vmul.f32 %v3965_v41, %v3965_v41 }
 0x1ff   : > { %v3705_v40 = vadd.f32 %v3704_v51, %v3703_v22  ;;  %v3991_v45 = vadd.f32 %v5111_v56, %v3702_v60  ;;  %v2726_v11 = vmul.f32 %v3969_v52, %v3969_v52  ;;  %v3977_v17 = vadd.f32 %v5233_v13, %v2409_v44 }
 0x200   : > { %v2688_v38 = vadd.f32 %v3969_v52, %v2687_v16  ;;  %v2756_v20 = vadd.f32 %v2755_v28, %v2725_v3  ;;  %v3289_v46 = vpack.c.bf16 %v3973_v0, %v3965_v41  ;;  %v2729_v4 = vmul.f32 %v3973_v0, %v3973_v0 }
 0x201   : > { %v3997_v9 = vadd.f32 %v5113_v47, %v3705_v40  ;;  %v3284_v35 = vpack.c.bf16 %v3977_v17, %v3969_v52  ;;  %v2727_v54 = vmul.f32 %v3977_v17, %v3977_v17 }
 0x202   : > { %v2757_v36 = vadd.f32 %v2756_v20, %v2726_v11  ;;  %v2689_v34 = vadd.f32 %v3977_v17, %v2688_v38  ;;  %3337 = vst [vmem:[%s5249_s24 + $0x38] sm:$0xff] %v3289_v46  }
 0x203   : > { %v3706_v18 = vpop.f32.mrb[128].mxu0  ;;  %3336 = vst [vmem:[%s5249_s24 + $0x30] sm:$0xff] %v3284_v35   ;;  %v3884_v56 = vpop.f32.mrb[0].mxu1 }
 0x204   : > { %v3707_v19 = vpop.f32.mrb[129].mxu0  ;;  %v2690_v15 = vadd.f32 %v3965_v41, %v2689_v34  ;;  %v2758_v10 = vadd.f32 %v2757_v36, %v2727_v54  ;;  %v3980_v13 = vadd.f32 %v5261_v29, %v3884_v56  ;;  %v2422_v42 = vpop.f32.mrb[1].mxu1 }
 0x205   : > { %v3708_v26 = vadd.f32 %v3707_v19, %v3706_v18  ;;  %v3709_v33 = vpop.f32.mrb[130].mxu0  ;;  %v3983_v12 = vadd.f32 %v5244_v43, %v2422_v42  ;;  %v3885_v53 = vpop.f32.mrb[2].mxu1 }
 0x206   : > { %v3710_v7 = vpop.f32.mrb[131].mxu0  ;;  %v2759_v47 = vadd.f32 %v2758_v10, %v2728_v2  ;;  %v2691_v37 = vadd.f32 %v3973_v0, %v2690_v15  ;;  %v3986_v39 = vadd.f32 %v5265_v63, %v3885_v53  ;;  %v2425_v25 = vpop.f32.mrb[3].mxu1  ;;  %v2732_v63 = vmul.f32 %v3980_v13, %v3980_v13 }
 0x207   : > { %v3711_v55 = vadd.f32 %v3710_v7, %v3709_v33  ;;  %v4006_v5 = vadd.f32 %v5129_v61, %v3708_v26  ;;  %v2730_v6 = vmul.f32 %v3983_v12, %v3983_v12  ;;  %v3989_v29 = vadd.f32 %v5253_v8, %v2425_v25 }
 0x208   : > { %v2692_v30 = vadd.f32 %v3983_v12, %v2691_v37  ;;  %v2760_v59 = vadd.f32 %v2759_v47, %v2729_v4  ;;  %v3299_v57 = vpack.c.bf16 %v3986_v39, %v3980_v13  ;;  %v2733_v16 = vmul.f32 %v3986_v39, %v3986_v39 }
 0x209   : > { %v4012_v31 = vadd.f32 %v5135_v24, %v3711_v55  ;;  %v3294_v43 = vpack.c.bf16 %v3989_v29, %v3983_v12  ;;  %v2731_v22 = vmul.f32 %v3989_v29, %v3989_v29 }
 0x20a   : > { %v2761_v1 = vadd.f32 %v2760_v59, %v2730_v6  ;;  %v2693_v60 = vadd.f32 %v3989_v29, %v2692_v30  ;;  %3339 = vst [vmem:[%s5249_s24 + $0x48] sm:$0xff] %v3299_v57  }
 0x20b   : > { %v3712_v3 = vpop.f32.mrb[132].mxu0  ;;  %3338 = vst [vmem:[%s5249_s24 + $0x40] sm:$0xff] %v3294_v43   ;;  %v3888_v61 = vpop.f32.mrb[4].mxu1 }
 0x20c   : > { %v3713_v41 = vpop.f32.mrb[133].mxu0  ;;  %v2694_v23 = vadd.f32 %v3980_v13, %v2693_v60  ;;  %v2762_v51 = vadd.f32 %v2761_v1, %v2731_v22  ;;  %v3992_v32 = vadd.f32 %v3991_v45, %v3888_v61  ;;  %v2438_v8 = vpop.f32.mrb[5].mxu1 }
 0x20d   : > { %v3714_v28 = vadd.f32 %v3713_v41, %v3712_v3  ;;  %v3715_v52 = vpop.f32.mrb[134].mxu0  ;;  %v3995_v24 = vadd.f32 %v5273_v14, %v2438_v8  ;;  %v3889_v38 = vpop.f32.mrb[6].mxu1 }
 0x20e   : > { %v3716_v40 = vpop.f32.mrb[135].mxu0  ;;  %v2763_v0 = vadd.f32 %v2762_v51, %v2732_v63  ;;  %v2695_v44 = vadd.f32 %v3986_v39, %v2694_v23  ;;  %v3998_v20 = vadd.f32 %v3997_v9, %v3889_v38  ;;  %v2441_v17 = vpop.f32.mrb[7].mxu1  ;;  %v2736_v9 = vmul.f32 %v3992_v32, %v3992_v32 }
 0x20f   : > { %v3717_v11 = vadd.f32 %v3716_v40, %v3715_v52  ;;  %v4003_v46 = vadd.f32 %v5151_v21, %v3714_v28  ;;  %v2734_v35 = vmul.f32 %v3995_v24, %v3995_v24  ;;  %v4001_v54 = vadd.f32 %v5277_v62, %v2441_v17 }
 0x210   : > { %v2696_v36 = vadd.f32 %v3995_v24, %v2695_v44  ;;  %v2764_v34 = vadd.f32 %v2763_v0, %v2733_v16  ;;  %v3309_v45 = vpack.c.bf16 %v3998_v20, %v3992_v32  ;;  %v2737_v42 = vmul.f32 %v3998_v20, %v3998_v20 }
 0x211   : > { %v4009_v18 = vadd.f32 %v5157_v48, %v3717_v11  ;;  %v3304_v2 = vpack.c.bf16 %v4001_v54, %v3995_v24  ;;  %v2735_v15 = vmul.f32 %v4001_v54, %v4001_v54 }
 0x212   : > { %v2765_v19 = vadd.f32 %v2764_v34, %v2734_v35  ;;  %v2697_v14 = vadd.f32 %v4001_v54, %v2696_v36  ;;  %3341 = vst [vmem:[%s5249_s24 + $0x58] sm:$0xff] %v3309_v45  }
 0x213   : > { %v3718_v10 = vpop.f32.mrb[136].mxu0  ;;  %3340 = vst [vmem:[%s5249_s24 + $0x50] sm:$0xff] %v3304_v2   ;;  %v3892_v21 = vpop.f32.mrb[8].mxu1 }
 0x214   : > { %v3719_v56 = vpop.f32.mrb[137].mxu0  ;;  %v2698_v26 = vadd.f32 %v3992_v32, %v2697_v14  ;;  %v2766_v33 = vadd.f32 %v2765_v19, %v2735_v15  ;;  %v4004_v7 = vadd.f32 %v4003_v46, %v3892_v21  ;;  %v2454_v62 = vpop.f32.mrb[9].mxu1 }
 0x215   : > { %v3720_v4 = vadd.f32 %v3719_v56, %v3718_v10  ;;  %v3721_v13 = vpop.f32.mrb[138].mxu0  ;;  %v4007_v48 = vadd.f32 %v4006_v5, %v2454_v62  ;;  %v3893_v53 = vpop.f32.mrb[10].mxu1 }
 0x216   : > { %v3722_v47 = vpop.f32.mrb[139].mxu0  ;;  %v2767_v12 = vadd.f32 %v2766_v33, %v2736_v9  ;;  %v2699_v37 = vadd.f32 %v3998_v20, %v2698_v26  ;;  %v4010_v39 = vadd.f32 %v4009_v18, %v3893_v53  ;;  %v2457_v25 = vpop.f32.mrb[11].mxu1  ;;  %v2740_v23 = vmul.f32 %v4004_v7, %v4004_v7 }
 0x217   : > { %v3723_v55 = vadd.f32 %v3722_v47, %v3721_v13  ;;  %v4018_v30 = vadd.f32 %v5173_v50, %v3720_v4  ;;  %v2738_v59 = vmul.f32 %v4007_v48, %v4007_v48  ;;  %v4013_v57 = vadd.f32 %v4012_v31, %v2457_v25 }
 0x218   : > { %v2700_v6 = vadd.f32 %v4007_v48, %v2699_v37  ;;  %v2768_v29 = vadd.f32 %v2767_v12, %v2737_v42  ;;  %v3319_v1 = vpack.c.bf16 %v4010_v39, %v4004_v7  ;;  %v2741_v16 = vmul.f32 %v4010_v39, %v4010_v39 }
 0x219   : > { %v4024_v43 = vadd.f32 %v5177_v49, %v3723_v55  ;;  %v3314_v22 = vpack.c.bf16 %v4013_v57, %v4007_v48  ;;  %v2739_v5 = vmul.f32 %v4013_v57, %v4013_v57 }
 0x21a   : > { %v2769_v60 = vadd.f32 %v2768_v29, %v2738_v59  ;;  %v2701_v3 = vadd.f32 %v4013_v57, %v2700_v6  ;;  %3343 = vst [vmem:[%s5249_s24 + $0x68] sm:$0xff] %v3319_v1  }
 0x21b   : > { %v3724_v41 = vpop.f32.mrb[140].mxu0  ;;  %3342 = vst [vmem:[%s5249_s24 + $0x60] sm:$0xff] %v3314_v22   ;;  %v3896_v28 = vpop.f32.mrb[12].mxu1 }
 0x21c   : > { %v3725_v63 = vpop.f32.mrb[141].mxu0  ;;  %v2702_v51 = vadd.f32 %v4004_v7, %v2701_v3  ;;  %v2770_v61 = vadd.f32 %v2769_v60, %v2739_v5  ;;  %v2470_v32 = vpop.f32.mrb[13].mxu1 }
 0x21d   : > { %v3726_v50 = vadd.f32 %v3725_v63, %v3724_v41  ;;  %v3727_v52 = vpop.f32.mrb[142].mxu0  ;;  %v4019_v40 = vadd.f32 %v4018_v30, %v2470_v32  ;;  %v3897_v24 = vpop.f32.mrb[14].mxu1 }
 0x21e   : > { %v3728_v31 = vpop.f32.mrb[143].mxu0  ;;  %v2771_v8 = vadd.f32 %v2770_v61, %v2740_v23  ;;  %v2703_v0 = vadd.f32 %v4010_v39, %v2702_v51  ;;  %v2473_v38 = vpop.f32.mrb[15].mxu1 }
 0x21f   : > { %v4015_v49 = vadd.f32 %v5193_v58, %v3726_v50  ;;  %v3729_v44 = vadd.f32 %v3728_v31, %v3727_v52  ;;  %v2742_v17 = vmul.f32 %v4019_v40, %v4019_v40  ;;  %v4025_v35 = vadd.f32 %v4024_v43, %v2473_v38 }
 0x220   : > { %v2704_v20 = vadd.f32 %v4019_v40, %v2703_v0  ;;  %v2772_v46 = vadd.f32 %v2771_v8, %v2741_v16 }
 0x221   : > { %v4016_v11 = vadd.f32 %v4015_v49, %v3896_v28  ;;  %v4021_v36 = vadd.f32 %v5197_v27, %v3729_v44  ;;  %v3324_v18 = vpack.c.bf16 %v4025_v35, %v4019_v40  ;;  %v2743_v58 = vmul.f32 %v4025_v35, %v4025_v35 }
 0x222   : > { %v2773_v54 = vadd.f32 %v2772_v46, %v2742_v17  ;;  %v2705_v19 = vadd.f32 %v4025_v35, %v2704_v20 }
 0x223   : > { %v2744_v34 = vmul.f32 %v4016_v11, %v4016_v11  ;;  %v4022_v45 = vadd.f32 %v4021_v36, %v3897_v24  ;;  %3344 = vst [vmem:[%s5249_s24 + $0x70] sm:$0xff] %v3324_v18  }
 0x224   : > { %v2706_v15 = vadd.f32 %v4016_v11, %v2705_v19  ;;  %v2774_v10 = vadd.f32 %v2773_v54, %v2743_v58 }
 0x225   : > { %v3329_v2 = vpack.c.bf16 %v4022_v45, %v4016_v11  ;;  %v2745_v14 = vmul.f32 %v4022_v45, %v4022_v45 }
 0x226   : > { %v2707_v56 = vadd.f32 %v4022_v45, %v2706_v15  ;;  %v2775_v9 = vadd.f32 %v2774_v10, %v2744_v34 }
 0x227   : > { %3345 = vst [vmem:[%s5249_s24 + $0x78] sm:$0xff] %v3329_v2  }
 0x228   : > { %v2708_v26 = vrot.slane %v2707_v56, 4  ;;  %v2776_v33 = vadd.f32 %v2775_v9, %v2745_v14 }
 0x22a   : > { %v2709_v21 = vadd.f32 %v2708_v26, %v2707_v56  ;;  %v2777_v27 = vrot.slane %v2776_v33, 4 }
 0x22c   : > { %v2710_v4 = vrot.slane %v2709_v21, 2  ;;  %v2778_v13 = vadd.f32 %v2777_v27, %v2776_v33 }
 0x22e   : > { %v2711_v42 = vadd.f32 %v2710_v4, %v2709_v21  ;;  %v2779_v7 = vrot.slane %v2778_v13, 2 }
 0x230   : > { %v2712_v62 = vrot.slane %v2711_v42, 1  ;;  %v2780_v47 = vadd.f32 %v2779_v7, %v2778_v13 }
 0x232   : > { %v2781_v12 = vrot.slane %v2780_v47, 1  ;;  %v2713_v48 = vadd.f32 %v2712_v62, %v2711_v42 }
 0x234   : > { %v2782_v37 = vadd.f32 %v2781_v12, %v2780_v47 }
 0x236   : > { %v2784_v53 = vsel %vm2783_vm2, %v2713_v48, %v2782_v37 }
 0x237   : > { %2785 = vst [vmem:[%s415_s29] sm:$0x3] %v2784_v53 }
 0x238 PF: > { %s16_s20 = sadd.s32 1, %s4239_s20   ;;  %s5332_s18 = smov %s4235_s19 }
 0x239   : > { %p13_p5 = scmp.ge.s32.totalorder %s16_s20, 4   ;;  %s5333_s19 = smov %s5335_s21 }
 0x23b   :  { %15 = sbr.rel (!%p13_p5) target bundleno = 2 (0x2), region = 86 }

</bundles_post_ra>
